<compile_context>
chip_gen: v5e
topology: v5e:2x2
jax: 0.10.0
libtpu: 0.0.40
codegen_flags: <defaults>
</compile_context>

<pallas_src>
import functools

import jax
import jax.numpy as jnp
from jax import lax
from jax.experimental import pallas as pl
from jax.experimental.pallas import tpu as pltpu

# Model hyper-parameters (cfg.n_hidden / cfg.n_layers stand-ins).
INPUT_SIZE = 16
HIDDEN_SIZE = 32
NUM_LAYERS = 2
OUT_SIZE = 8
OUT_PAD = 128      # lane-dense padded output width; real columns sliced out after the call

BATCH_TILE = 8     # sublane-aligned; use 128 on v5e / 256 on v6e & v7x for real batches
T_CHUNK_MAX = 32   # max timesteps per bulk-gate chunk (bounds the gates VMEM scratch)


def _largest_divisor_leq(n, cap):
    for d in range(min(n, cap), 0, -1):
        if n % d == 0:
            return d
    return 1


def _lstm_fc_kernel(num_layers, hidden, t_chunk, x_ref, *refs):
    """One batch tile of the full forward pass.

    x_ref: (S, BT, IN) f32 time-major input block.
    refs = per-layer (w_ih_T bf16, w_hh_T bf16, bias f32) ..., fc_w_T bf16, fc_b f32,
           out_ref, then scratch: gates (T_CHUNK, BT, 4H) f32, h-sequence (S, BT, H) bf16.
    """
    n_param = 3 * num_layers + 2
    param_refs = refs[:n_param]
    out_ref = refs[n_param]
    gates_ref, hseq_ref = refs[n_param + 1:]

    fc_w_ref = param_refs[3 * num_layers]
    fc_b_ref = param_refs[3 * num_layers + 1]

    H = hidden
    S, BT, _ = x_ref.shape
    G = 4 * H
    n_chunks = S // t_chunk

    # Lane mask selecting the g-gate (tanh) quarter of the fused (i, f, g, o) gates.
    lane = lax.broadcasted_iota(jnp.int32, (BT, G), 1)
    g_lane = (lane >= 2 * H) & (lane < 3 * H)

    h = jnp.zeros((BT, H), jnp.bfloat16)  # overwritten per layer (h0 = 0)

    for l in range(num_layers):
        w_ih_ref = param_refs[3 * l]       # (in_l, 4H) bf16
        w_hh_ref = param_refs[3 * l + 1]   # (H, 4H)    bf16
        bias_ref = param_refs[3 * l + 2]   # (1, 4H)    f32  (b_ih + b_hh)
        last_layer = l == num_layers - 1
        in_l = w_ih_ref.shape[0]

        h = jnp.zeros((BT, H), jnp.bfloat16)
        c = jnp.zeros((BT, H), jnp.float32)

        for ci in range(n_chunks):
            t0 = ci * t_chunk

            # ---- bulk input projection for this time-chunk: one big bf16 MXU matmul ----
            if l == 0:
                inp = x_ref[pl.ds(t0, t_chunk)].reshape(t_chunk * BT, in_l).astype(jnp.bfloat16)
            else:
                inp = hseq_ref[pl.ds(t0, t_chunk)].reshape(t_chunk * BT, in_l)  # already bf16
            pre = jnp.dot(inp, w_ih_ref[...], preferred_element_type=jnp.float32) + bias_ref[...]
            gates_ref[...] = pre.reshape(t_chunk, BT, G)

            # ---- serial recurrence: only h @ W_hh remains on the critical path ----
            def step(tt, carry, _t0=t0, _last=last_layer):
                hb, cc = carry  # (BT, H) bf16 / f32
                gates = gates_ref[tt] + jnp.dot(
                    hb, w_hh_ref[...], preferred_element_type=jnp.float32)
                # Single full-width sigmoid; tanh(x) = 2*sigmoid(2x) - 1 on the g lanes.
                sig = jax.nn.sigmoid(jnp.where(g_lane, 2.0 * gates, gates))
                acts = jnp.where(g_lane, 2.0 * sig - 1.0, sig)
                i_g = acts[:, 0 * H:1 * H]
                f_g = acts[:, 1 * H:2 * H]
                g_g = acts[:, 2 * H:3 * H]
                o_g = acts[:, 3 * H:4 * H]
                c_new = f_g * cc + i_g * g_g
                h_new = o_g * jnp.tanh(c_new)
                h_bf = h_new.astype(jnp.bfloat16)
                if not _last:
                    hseq_ref[_t0 + tt] = h_bf  # feeds the next layer's bulk matmul
                return h_bf, c_new

            # h0 = c0 = 0 (matches torch.zeros init); bounded unroll keeps vreg pressure sane.
            h, c = lax.fori_loop(0, t_chunk, step, (h, c), unroll=min(t_chunk, 8))

    # fc(output[-1, :, :]) == fc(top-layer h at the last timestep); lane-dense padded store.
    out = jnp.dot(h, fc_w_ref[...], preferred_element_type=jnp.float32) + fc_b_ref[...]
    out_ref[...] = out.astype(out_ref.dtype)


def lstm_wrapper_forward(x, params):
    """x: (batch, seq, input) float32 -> (batch, OUT_SIZE) float32."""
    B, S, IN_ = x.shape
    nbt = pl.cdiv(B, BATCH_TILE)
    b_pad = nbt * BATCH_TILE
    t_chunk = _largest_divisor_leq(S, T_CHUNK_MAX)

    # Zero-pad batch to the sublane tile and transpose to time-major (one fused XLA op).
    x_tm = jnp.transpose(jnp.pad(x, ((0, b_pad - B), (0, 0), (0, 0))), (1, 0, 2))

    flat_params = []
    for (w_ih, w_hh, b_ih, b_hh) in params["layers"]:
        flat_params.append(jnp.transpose(w_ih).astype(jnp.bfloat16))     # (in_l, 4H)
        flat_params.append(jnp.transpose(w_hh).astype(jnp.bfloat16))     # (H, 4H)
        flat_params.append((b_ih + b_hh)[None, :].astype(jnp.float32))   # (1, 4H)
    # FC padded to a lane-dense OUT_PAD-wide slab (unmasked stores).
    fc_w_p = jnp.zeros((HIDDEN_SIZE, OUT_PAD), jnp.bfloat16).at[:, :OUT_SIZE].set(
        jnp.transpose(params["fc_w"]).astype(jnp.bfloat16))
    fc_b_p = jnp.zeros((1, OUT_PAD), jnp.float32).at[0, :OUT_SIZE].set(
        params["fc_b"].astype(jnp.float32))
    flat_params.append(fc_w_p)
    flat_params.append(fc_b_p)

    kernel = functools.partial(_lstm_fc_kernel, NUM_LAYERS, HIDDEN_SIZE, t_chunk)

    def full_spec(p):
        return pl.BlockSpec(p.shape, lambda i, _nd=p.ndim: (0,) * _nd)

    out_pad = pl.pallas_call(
        kernel,
        out_shape=jax.ShapeDtypeStruct((b_pad, OUT_PAD), jnp.float32),
        grid=(nbt,),
        in_specs=[pl.BlockSpec((S, BATCH_TILE, IN_), lambda i: (0, i, 0))]
                 + [full_spec(p) for p in flat_params],
        out_specs=pl.BlockSpec((BATCH_TILE, OUT_PAD), lambda i: (i, 0)),
        scratch_shapes=[
            pltpu.VMEM((t_chunk, BATCH_TILE, 4 * HIDDEN_SIZE), jnp.float32),  # chunked gate precompute
            pltpu.VMEM((S, BATCH_TILE, HIDDEN_SIZE), jnp.bfloat16),           # h sequence for next layer
        ],
        compiler_params=pltpu.CompilerParams(dimension_semantics=("parallel",)),
    )(x_tm, *flat_params)
    return out_pad[:B, :OUT_SIZE]


def init_params(key):
    """Deterministic synthetic params, PyTorch-style uniform(-1/sqrt(H), 1/sqrt(H))."""
    bound = 1.0 / (HIDDEN_SIZE ** 0.5)
    layers = []
    for l in range(NUM_LAYERS):
        in_size = INPUT_SIZE if l == 0 else HIDDEN_SIZE
        key, k1, k2, k3, k4 = jax.random.split(key, 5)
        w_ih = jax.random.uniform(k1, (4 * HIDDEN_SIZE, in_size), jnp.float32, -bound, bound)
        w_hh = jax.random.uniform(k2, (4 * HIDDEN_SIZE, HIDDEN_SIZE), jnp.float32, -bound, bound)
        b_ih = jax.random.uniform(k3, (4 * HIDDEN_SIZE,), jnp.float32, -bound, bound)
        b_hh = jax.random.uniform(k4, (4 * HIDDEN_SIZE,), jnp.float32, -bound, bound)
        layers.append((w_ih, w_hh, b_ih, b_hh))
    key, kw, kb = jax.random.split(key, 3)
    fc_w = jax.random.uniform(kw, (OUT_SIZE, HIDDEN_SIZE), jnp.float32, -bound, bound)
    fc_b = jax.random.uniform(kb, (OUT_SIZE,), jnp.float32, -bound, bound)
    return {"layers": layers, "fc_w": fc_w, "fc_b": fc_b}


def reference_forward(x, params):
    """Pure-JAX mirror of the PyTorch module, with matmul inputs cast to bf16 and f32
    accumulation to match the kernel's precision (PyTorch semantics modulo bf16 matmuls)."""
    B, S, _ = x.shape
    bf16, f32 = jnp.bfloat16, jnp.float32
    h = [jnp.zeros((B, HIDDEN_SIZE), f32) for _ in range(NUM_LAYERS)]
    c = [jnp.zeros((B, HIDDEN_SIZE), f32) for _ in range(NUM_LAYERS)]
    for t in range(S):
        inp = x[:, t, :]
        for l, (w_ih, w_hh, b_ih, b_hh) in enumerate(params["layers"]):
            gates = (jnp.dot(inp.astype(bf16), w_ih.T.astype(bf16), preferred_element_type=f32)
                     + jnp.dot(h[l].astype(bf16), w_hh.T.astype(bf16), preferred_element_type=f32)
                     + b_ih + b_hh)
            i, f, g, o = jnp.split(gates, 4, axis=-1)
            i, f, o = jax.nn.sigmoid(i), jax.nn.sigmoid(f), jax.nn.sigmoid(o)
            g = jnp.tanh(g)
            c[l] = f * c[l] + i * g
            h[l] = o * jnp.tanh(c[l])
            inp = h[l].astype(bf16)
    return (jnp.dot(h[-1].astype(bf16), params["fc_w"].T.astype(bf16),
                    preferred_element_type=f32) + params["fc_b"])


if __name__ == "__main__":
    key = jax.random.PRNGKey(0)
    pkey, xkey = jax.random.split(key)
    params = init_params(pkey)

    BATCH, SEQ = 2, 8
    x = jax.random.normal(xkey, (BATCH, SEQ, INPUT_SIZE), dtype=jnp.float32)

    out = jax.block_until_ready(lstm_wrapper_forward(x, params))
    ref = reference_forward(x, params)

    assert out.shape == (BATCH, OUT_SIZE), out.shape
    assert jnp.allclose(out, ref, atol=2e-3, rtol=2e-3), "Pallas output mismatch vs reference"
    print("KERNEL_OK")
</pallas_src>

<mosaic_0001>
module attributes {stable_mosaic.version = 11 : i64} {
  func.func @_lstm_fc_kernel(%arg0: i32, %arg1: memref<8x8x16xf32, #tpu.memory_space<vmem>>, %arg2: memref<16x128xbf16, #tpu.memory_space<vmem>>, %arg3: memref<32x128xbf16, #tpu.memory_space<vmem>>, %arg4: memref<1x128xf32, #tpu.memory_space<vmem>>, %arg5: memref<32x128xbf16, #tpu.memory_space<vmem>>, %arg6: memref<32x128xbf16, #tpu.memory_space<vmem>>, %arg7: memref<1x128xf32, #tpu.memory_space<vmem>>, %arg8: memref<32x128xbf16, #tpu.memory_space<vmem>>, %arg9: memref<1x128xf32, #tpu.memory_space<vmem>>, %arg10: memref<8x128xf32, #tpu.memory_space<vmem>>, %arg11: memref<8x8x128xf32, #tpu.memory_space<vmem>>, %arg12: memref<8x8x32xbf16, #tpu.memory_space<vmem>>) attributes {dimension_semantics = [#tpu.dimension_semantics<parallel>], iteration_bounds = array<i64: 1>, scalar_prefetch = 0 : i64, scratch_operands = 2 : i64, tpu.core_type = #tpu.core_type<tc>, window_params = [{transform_indices = @transform_0, window_bounds = array<i64: 8, 8, 16>}, {pipeline_mode = #tpu.pipeline_mode<synchronous>, transform_indices = @transform_1, window_bounds = array<i64: 16, 128>}, {pipeline_mode = #tpu.pipeline_mode<synchronous>, transform_indices = @transform_2, window_bounds = array<i64: 32, 128>}, {pipeline_mode = #tpu.pipeline_mode<synchronous>, transform_indices = @transform_3, window_bounds = array<i64: 1, 128>}, {pipeline_mode = #tpu.pipeline_mode<synchronous>, transform_indices = @transform_4, window_bounds = array<i64: 32, 128>}, {pipeline_mode = #tpu.pipeline_mode<synchronous>, transform_indices = @transform_5, window_bounds = array<i64: 32, 128>}, {pipeline_mode = #tpu.pipeline_mode<synchronous>, transform_indices = @transform_6, window_bounds = array<i64: 1, 128>}, {pipeline_mode = #tpu.pipeline_mode<synchronous>, transform_indices = @transform_7, window_bounds = array<i64: 32, 128>}, {pipeline_mode = #tpu.pipeline_mode<synchronous>, transform_indices = @transform_8, window_bounds = array<i64: 1, 128>}, {transform_indices = @transform_9, window_bounds = array<i64: 8, 128>}]} {
    %0 = tpu.iota {dimensions = array<i32: 1>} : vector<8x128xi32>
    %c64_i32 = arith.constant 64 : i32
    %1 = vector.broadcast %c64_i32 : i32 to vector<8x128xi32>
    %2 = arith.cmpi sge, %0, %1 : vector<8x128xi32>
    %c96_i32 = arith.constant 96 : i32
    %3 = vector.broadcast %c96_i32 : i32 to vector<8x128xi32>
    %4 = arith.cmpi slt, %0, %3 : vector<8x128xi32>
    %5 = arith.andi %2, %4 : vector<8x128xi1>
    %cst = arith.constant 0.000000e+00 : bf16
    %6 = vector.broadcast %cst : bf16 to vector<8x32xbf16>
    %cst_0 = arith.constant 0.000000e+00 : f32
    %7 = vector.broadcast %cst_0 : f32 to vector<8x32xf32>
    %c0 = arith.constant 0 : index
    %c0_1 = arith.constant 0 : index
    %c0_2 = arith.constant 0 : index
    %8 = vector.load %arg1[%c0, %c0_1, %c0_2] : memref<8x8x16xf32, #tpu.memory_space<vmem>>, vector<8x8x16xf32>
    %9 = vector.shape_cast %8 : vector<8x8x16xf32> to vector<64x16xf32>
    %10 = arith.truncf %9 : vector<64x16xf32> to vector<64x16xbf16>
    %c0_3 = arith.constant 0 : index
    %c0_4 = arith.constant 0 : index
    %11 = vector.load %arg2[%c0_3, %c0_4] : memref<16x128xbf16, #tpu.memory_space<vmem>>, vector<16x128xbf16>
    %cst_5 = arith.constant dense<0.000000e+00> : vector<64x128xf32>
    %12 = tpu.matmul %10, %11, %cst_5 {dimension_numbers = #tpu.dot_dimension_numbers<[1], [0], [0], [1], [0, 0, 1, 1], [], []>} : vector<64x16xbf16>, vector<16x128xbf16>, vector<64x128xf32> -> vector<64x128xf32>
    %c0_6 = arith.constant 0 : index
    %c0_7 = arith.constant 0 : index
    %13 = vector.load %arg4[%c0_6, %c0_7] : memref<1x128xf32, #tpu.memory_space<vmem>>, vector<1x128xf32>
    %14 = vector.broadcast %13 : vector<1x128xf32> to vector<64x128xf32>
    %15 = arith.addf %12, %14 : vector<64x128xf32>
    %16 = vector.shape_cast %15 : vector<64x128xf32> to vector<8x8x128xf32>
    %c0_8 = arith.constant 0 : index
    %c0_9 = arith.constant 0 : index
    %c0_10 = arith.constant 0 : index
    %17 = vector.load %arg11[%c0_8, %c0_9, %c0_10] : memref<8x8x128xf32, #tpu.memory_space<vmem>>, vector<8x8x128xf32>
    tpu.vector_store %arg11[%c0_8, %c0_9, %c0_10], %16 {strides = array<i32>} : memref<8x8x128xf32, #tpu.memory_space<vmem>>, vector<8x8x128xf32>,
    %c0_i32 = arith.constant 0 : i32
    %18 = arith.index_cast %c0_i32 : i32 to index
    %c0_11 = arith.constant 0 : index
    %c0_12 = arith.constant 0 : index
    %19 = vector.load %arg11[%18, %c0_11, %c0_12] : memref<8x8x128xf32, #tpu.memory_space<vmem>>, vector<1x8x128xf32>
    %20 = vector.shape_cast %19 : vector<1x8x128xf32> to vector<8x128xf32>
    %c0_13 = arith.constant 0 : index
    %c0_14 = arith.constant 0 : index
    %21 = vector.load %arg3[%c0_13, %c0_14] : memref<32x128xbf16, #tpu.memory_space<vmem>>, vector<32x128xbf16>
    %cst_15 = arith.constant dense<0.000000e+00> : vector<8x128xf32>
    %22 = tpu.matmul %6, %21, %cst_15 {dimension_numbers = #tpu.dot_dimension_numbers<[1], [0], [0], [1], [0, 0, 1, 1], [], []>} : vector<8x32xbf16>, vector<32x128xbf16>, vector<8x128xf32> -> vector<8x128xf32>
    %23 = arith.addf %20, %22 : vector<8x128xf32>
    %cst_16 = arith.constant 2.000000e+00 : f32
    %24 = vector.broadcast %cst_16 : f32 to vector<8x128xf32>
    %25 = arith.mulf %24, %23 : vector<8x128xf32>
    %26 = arith.select %5, %25, %23 : vector<8x128xi1>, vector<8x128xf32>
    %27 = arith.negf %26 : vector<8x128xf32>
    %28 = math.exp %27 : vector<8x128xf32>
    %cst_17 = arith.constant 1.000000e+00 : f32
    %29 = vector.broadcast %cst_17 : f32 to vector<8x128xf32>
    %30 = arith.addf %29, %28 : vector<8x128xf32>
    %31 = arith.divf %29, %30 : vector<8x128xf32>
    %cst_18 = arith.constant 2.000000e+00 : f32
    %32 = vector.broadcast %cst_18 : f32 to vector<8x128xf32>
    %33 = arith.mulf %32, %31 : vector<8x128xf32>
    %cst_19 = arith.constant 1.000000e+00 : f32
    %34 = vector.broadcast %cst_19 : f32 to vector<8x128xf32>
    %35 = arith.subf %33, %34 : vector<8x128xf32>
    %36 = arith.select %5, %35, %31 : vector<8x128xi1>, vector<8x128xf32>
    %37 = vector.extract_strided_slice %36 {offsets = [0, 0], sizes = [8, 32], strides = [1, 1]} : vector<8x128xf32> to vector<8x32xf32>
    %38 = vector.extract_strided_slice %36 {offsets = [0, 32], sizes = [8, 32], strides = [1, 1]} : vector<8x128xf32> to vector<8x32xf32>
    %39 = vector.extract_strided_slice %36 {offsets = [0, 64], sizes = [8, 32], strides = [1, 1]} : vector<8x128xf32> to vector<8x32xf32>
    %40 = vector.extract_strided_slice %36 {offsets = [0, 96], sizes = [8, 32], strides = [1, 1]} : vector<8x128xf32> to vector<8x32xf32>
    %41 = arith.mulf %38, %7 : vector<8x32xf32>
    %42 = arith.mulf %37, %39 : vector<8x32xf32>
    %43 = arith.addf %41, %42 : vector<8x32xf32>
    %44 = math.tanh %43 : vector<8x32xf32>
    %45 = arith.mulf %40, %44 : vector<8x32xf32>
    %46 = arith.truncf %45 : vector<8x32xf32> to vector<8x32xbf16>
    %c0_i32_20 = arith.constant 0 : i32
    %47 = arith.addi %c0_i32_20, %c0_i32 : i32
    %48 = arith.index_cast %47 : i32 to index
    %c0_21 = arith.constant 0 : index
    %c0_22 = arith.constant 0 : index
    %49 = vector.load %arg12[%48, %c0_21, %c0_22] : memref<8x8x32xbf16, #tpu.memory_space<vmem>>, vector<1x8x32xbf16>
    %50 = vector.shape_cast %49 : vector<1x8x32xbf16> to vector<8x32xbf16>
    %51 = vector.shape_cast %46 : vector<8x32xbf16> to vector<1x8x32xbf16>
    tpu.vector_store %arg12[%48, %c0_21, %c0_22], %51 {strides = array<i32>} : memref<8x8x32xbf16, #tpu.memory_space<vmem>>, vector<1x8x32xbf16>,
    %c1_i32 = arith.constant 1 : i32
    %52 = arith.index_cast %c1_i32 : i32 to index
    %c0_23 = arith.constant 0 : index
    %c0_24 = arith.constant 0 : index
    %53 = vector.load %arg11[%52, %c0_23, %c0_24] : memref<8x8x128xf32, #tpu.memory_space<vmem>>, vector<1x8x128xf32>
    %54 = vector.shape_cast %53 : vector<1x8x128xf32> to vector<8x128xf32>
    %c0_25 = arith.constant 0 : index
    %c0_26 = arith.constant 0 : index
    %55 = vector.load %arg3[%c0_25, %c0_26] : memref<32x128xbf16, #tpu.memory_space<vmem>>, vector<32x128xbf16>
    %cst_27 = arith.constant dense<0.000000e+00> : vector<8x128xf32>
    %56 = tpu.matmul %46, %55, %cst_27 {dimension_numbers = #tpu.dot_dimension_numbers<[1], [0], [0], [1], [0, 0, 1, 1], [], []>} : vector<8x32xbf16>, vector<32x128xbf16>, vector<8x128xf32> -> vector<8x128xf32>
    %57 = arith.addf %54, %56 : vector<8x128xf32>
    %cst_28 = arith.constant 2.000000e+00 : f32
    %58 = vector.broadcast %cst_28 : f32 to vector<8x128xf32>
    %59 = arith.mulf %58, %57 : vector<8x128xf32>
    %60 = arith.select %5, %59, %57 : vector<8x128xi1>, vector<8x128xf32>
    %61 = arith.negf %60 : vector<8x128xf32>
    %62 = math.exp %61 : vector<8x128xf32>
    %cst_29 = arith.constant 1.000000e+00 : f32
    %63 = vector.broadcast %cst_29 : f32 to vector<8x128xf32>
    %64 = arith.addf %63, %62 : vector<8x128xf32>
    %65 = arith.divf %63, %64 : vector<8x128xf32>
    %cst_30 = arith.constant 2.000000e+00 : f32
    %66 = vector.broadcast %cst_30 : f32 to vector<8x128xf32>
    %67 = arith.mulf %66, %65 : vector<8x128xf32>
    %cst_31 = arith.constant 1.000000e+00 : f32
    %68 = vector.broadcast %cst_31 : f32 to vector<8x128xf32>
    %69 = arith.subf %67, %68 : vector<8x128xf32>
    %70 = arith.select %5, %69, %65 : vector<8x128xi1>, vector<8x128xf32>
    %71 = vector.extract_strided_slice %70 {offsets = [0, 0], sizes = [8, 32], strides = [1, 1]} : vector<8x128xf32> to vector<8x32xf32>
    %72 = vector.extract_strided_slice %70 {offsets = [0, 32], sizes = [8, 32], strides = [1, 1]} : vector<8x128xf32> to vector<8x32xf32>
    %73 = vector.extract_strided_slice %70 {offsets = [0, 64], sizes = [8, 32], strides = [1, 1]} : vector<8x128xf32> to vector<8x32xf32>
    %74 = vector.extract_strided_slice %70 {offsets = [0, 96], sizes = [8, 32], strides = [1, 1]} : vector<8x128xf32> to vector<8x32xf32>
    %75 = arith.mulf %72, %43 : vector<8x32xf32>
    %76 = arith.mulf %71, %73 : vector<8x32xf32>
    %77 = arith.addf %75, %76 : vector<8x32xf32>
    %78 = math.tanh %77 : vector<8x32xf32>
    %79 = arith.mulf %74, %78 : vector<8x32xf32>
    %80 = arith.truncf %79 : vector<8x32xf32> to vector<8x32xbf16>
    %c0_i32_32 = arith.constant 0 : i32
    %81 = arith.addi %c0_i32_32, %c1_i32 : i32
    %82 = arith.index_cast %81 : i32 to index
    %c0_33 = arith.constant 0 : index
    %c0_34 = arith.constant 0 : index
    %83 = vector.load %arg12[%82, %c0_33, %c0_34] : memref<8x8x32xbf16, #tpu.memory_space<vmem>>, vector<1x8x32xbf16>
    %84 = vector.shape_cast %83 : vector<1x8x32xbf16> to vector<8x32xbf16>
    %85 = vector.shape_cast %80 : vector<8x32xbf16> to vector<1x8x32xbf16>
    tpu.vector_store %arg12[%82, %c0_33, %c0_34], %85 {strides = array<i32>} : memref<8x8x32xbf16, #tpu.memory_space<vmem>>, vector<1x8x32xbf16>,
    %c2_i32 = arith.constant 2 : i32
    %86 = arith.index_cast %c2_i32 : i32 to index
    %c0_35 = arith.constant 0 : index
    %c0_36 = arith.constant 0 : index
    %87 = vector.load %arg11[%86, %c0_35, %c0_36] : memref<8x8x128xf32, #tpu.memory_space<vmem>>, vector<1x8x128xf32>
    %88 = vector.shape_cast %87 : vector<1x8x128xf32> to vector<8x128xf32>
    %c0_37 = arith.constant 0 : index
    %c0_38 = arith.constant 0 : index
    %89 = vector.load %arg3[%c0_37, %c0_38] : memref<32x128xbf16, #tpu.memory_space<vmem>>, vector<32x128xbf16>
    %cst_39 = arith.constant dense<0.000000e+00> : vector<8x128xf32>
    %90 = tpu.matmul %80, %89, %cst_39 {dimension_numbers = #tpu.dot_dimension_numbers<[1], [0], [0], [1], [0, 0, 1, 1], [], []>} : vector<8x32xbf16>, vector<32x128xbf16>, vector<8x128xf32> -> vector<8x128xf32>
    %91 = arith.addf %88, %90 : vector<8x128xf32>
    %cst_40 = arith.constant 2.000000e+00 : f32
    %92 = vector.broadcast %cst_40 : f32 to vector<8x128xf32>
    %93 = arith.mulf %92, %91 : vector<8x128xf32>
    %94 = arith.select %5, %93, %91 : vector<8x128xi1>, vector<8x128xf32>
    %95 = arith.negf %94 : vector<8x128xf32>
    %96 = math.exp %95 : vector<8x128xf32>
    %cst_41 = arith.constant 1.000000e+00 : f32
    %97 = vector.broadcast %cst_41 : f32 to vector<8x128xf32>
    %98 = arith.addf %97, %96 : vector<8x128xf32>
    %99 = arith.divf %97, %98 : vector<8x128xf32>
    %cst_42 = arith.constant 2.000000e+00 : f32
    %100 = vector.broadcast %cst_42 : f32 to vector<8x128xf32>
    %101 = arith.mulf %100, %99 : vector<8x128xf32>
    %cst_43 = arith.constant 1.000000e+00 : f32
    %102 = vector.broadcast %cst_43 : f32 to vector<8x128xf32>
    %103 = arith.subf %101, %102 : vector<8x128xf32>
    %104 = arith.select %5, %103, %99 : vector<8x128xi1>, vector<8x128xf32>
    %105 = vector.extract_strided_slice %104 {offsets = [0, 0], sizes = [8, 32], strides = [1, 1]} : vector<8x128xf32> to vector<8x32xf32>
    %106 = vector.extract_strided_slice %104 {offsets = [0, 32], sizes = [8, 32], strides = [1, 1]} : vector<8x128xf32> to vector<8x32xf32>
    %107 = vector.extract_strided_slice %104 {offsets = [0, 64], sizes = [8, 32], strides = [1, 1]} : vector<8x128xf32> to vector<8x32xf32>
    %108 = vector.extract_strided_slice %104 {offsets = [0, 96], sizes = [8, 32], strides = [1, 1]} : vector<8x128xf32> to vector<8x32xf32>
    %109 = arith.mulf %106, %77 : vector<8x32xf32>
    %110 = arith.mulf %105, %107 : vector<8x32xf32>
    %111 = arith.addf %109, %110 : vector<8x32xf32>
    %112 = math.tanh %111 : vector<8x32xf32>
    %113 = arith.mulf %108, %112 : vector<8x32xf32>
    %114 = arith.truncf %113 : vector<8x32xf32> to vector<8x32xbf16>
    %c0_i32_44 = arith.constant 0 : i32
    %115 = arith.addi %c0_i32_44, %c2_i32 : i32
    %116 = arith.index_cast %115 : i32 to index
    %c0_45 = arith.constant 0 : index
    %c0_46 = arith.constant 0 : index
    %117 = vector.load %arg12[%116, %c0_45, %c0_46] : memref<8x8x32xbf16, #tpu.memory_space<vmem>>, vector<1x8x32xbf16>
    %118 = vector.shape_cast %117 : vector<1x8x32xbf16> to vector<8x32xbf16>
    %119 = vector.shape_cast %114 : vector<8x32xbf16> to vector<1x8x32xbf16>
    tpu.vector_store %arg12[%116, %c0_45, %c0_46], %119 {strides = array<i32>} : memref<8x8x32xbf16, #tpu.memory_space<vmem>>, vector<1x8x32xbf16>,
    %c3_i32 = arith.constant 3 : i32
    %120 = arith.index_cast %c3_i32 : i32 to index
    %c0_47 = arith.constant 0 : index
    %c0_48 = arith.constant 0 : index
    %121 = vector.load %arg11[%120, %c0_47, %c0_48] : memref<8x8x128xf32, #tpu.memory_space<vmem>>, vector<1x8x128xf32>
    %122 = vector.shape_cast %121 : vector<1x8x128xf32> to vector<8x128xf32>
    %c0_49 = arith.constant 0 : index
    %c0_50 = arith.constant 0 : index
    %123 = vector.load %arg3[%c0_49, %c0_50] : memref<32x128xbf16, #tpu.memory_space<vmem>>, vector<32x128xbf16>
    %cst_51 = arith.constant dense<0.000000e+00> : vector<8x128xf32>
    %124 = tpu.matmul %114, %123, %cst_51 {dimension_numbers = #tpu.dot_dimension_numbers<[1], [0], [0], [1], [0, 0, 1, 1], [], []>} : vector<8x32xbf16>, vector<32x128xbf16>, vector<8x128xf32> -> vector<8x128xf32>
    %125 = arith.addf %122, %124 : vector<8x128xf32>
    %cst_52 = arith.constant 2.000000e+00 : f32
    %126 = vector.broadcast %cst_52 : f32 to vector<8x128xf32>
    %127 = arith.mulf %126, %125 : vector<8x128xf32>
    %128 = arith.select %5, %127, %125 : vector<8x128xi1>, vector<8x128xf32>
    %129 = arith.negf %128 : vector<8x128xf32>
    %130 = math.exp %129 : vector<8x128xf32>
    %cst_53 = arith.constant 1.000000e+00 : f32
    %131 = vector.broadcast %cst_53 : f32 to vector<8x128xf32>
    %132 = arith.addf %131, %130 : vector<8x128xf32>
    %133 = arith.divf %131, %132 : vector<8x128xf32>
    %cst_54 = arith.constant 2.000000e+00 : f32
    %134 = vector.broadcast %cst_54 : f32 to vector<8x128xf32>
    %135 = arith.mulf %134, %133 : vector<8x128xf32>
    %cst_55 = arith.constant 1.000000e+00 : f32
    %136 = vector.broadcast %cst_55 : f32 to vector<8x128xf32>
    %137 = arith.subf %135, %136 : vector<8x128xf32>
    %138 = arith.select %5, %137, %133 : vector<8x128xi1>, vector<8x128xf32>
    %139 = vector.extract_strided_slice %138 {offsets = [0, 0], sizes = [8, 32], strides = [1, 1]} : vector<8x128xf32> to vector<8x32xf32>
    %140 = vector.extract_strided_slice %138 {offsets = [0, 32], sizes = [8, 32], strides = [1, 1]} : vector<8x128xf32> to vector<8x32xf32>
    %141 = vector.extract_strided_slice %138 {offsets = [0, 64], sizes = [8, 32], strides = [1, 1]} : vector<8x128xf32> to vector<8x32xf32>
    %142 = vector.extract_strided_slice %138 {offsets = [0, 96], sizes = [8, 32], strides = [1, 1]} : vector<8x128xf32> to vector<8x32xf32>
    %143 = arith.mulf %140, %111 : vector<8x32xf32>
    %144 = arith.mulf %139, %141 : vector<8x32xf32>
    %145 = arith.addf %143, %144 : vector<8x32xf32>
    %146 = math.tanh %145 : vector<8x32xf32>
    %147 = arith.mulf %142, %146 : vector<8x32xf32>
    %148 = arith.truncf %147 : vector<8x32xf32> to vector<8x32xbf16>
    %c0_i32_56 = arith.constant 0 : i32
    %149 = arith.addi %c0_i32_56, %c3_i32 : i32
    %150 = arith.index_cast %149 : i32 to index
    %c0_57 = arith.constant 0 : index
    %c0_58 = arith.constant 0 : index
    %151 = vector.load %arg12[%150, %c0_57, %c0_58] : memref<8x8x32xbf16, #tpu.memory_space<vmem>>, vector<1x8x32xbf16>
    %152 = vector.shape_cast %151 : vector<1x8x32xbf16> to vector<8x32xbf16>
    %153 = vector.shape_cast %148 : vector<8x32xbf16> to vector<1x8x32xbf16>
    tpu.vector_store %arg12[%150, %c0_57, %c0_58], %153 {strides = array<i32>} : memref<8x8x32xbf16, #tpu.memory_space<vmem>>, vector<1x8x32xbf16>,
    %c4_i32 = arith.constant 4 : i32
    %154 = arith.index_cast %c4_i32 : i32 to index
    %c0_59 = arith.constant 0 : index
    %c0_60 = arith.constant 0 : index
    %155 = vector.load %arg11[%154, %c0_59, %c0_60] : memref<8x8x128xf32, #tpu.memory_space<vmem>>, vector<1x8x128xf32>
    %156 = vector.shape_cast %155 : vector<1x8x128xf32> to vector<8x128xf32>
    %c0_61 = arith.constant 0 : index
    %c0_62 = arith.constant 0 : index
    %157 = vector.load %arg3[%c0_61, %c0_62] : memref<32x128xbf16, #tpu.memory_space<vmem>>, vector<32x128xbf16>
    %cst_63 = arith.constant dense<0.000000e+00> : vector<8x128xf32>
    %158 = tpu.matmul %148, %157, %cst_63 {dimension_numbers = #tpu.dot_dimension_numbers<[1], [0], [0], [1], [0, 0, 1, 1], [], []>} : vector<8x32xbf16>, vector<32x128xbf16>, vector<8x128xf32> -> vector<8x128xf32>
    %159 = arith.addf %156, %158 : vector<8x128xf32>
    %cst_64 = arith.constant 2.000000e+00 : f32
    %160 = vector.broadcast %cst_64 : f32 to vector<8x128xf32>
    %161 = arith.mulf %160, %159 : vector<8x128xf32>
    %162 = arith.select %5, %161, %159 : vector<8x128xi1>, vector<8x128xf32>
    %163 = arith.negf %162 : vector<8x128xf32>
    %164 = math.exp %163 : vector<8x128xf32>
    %cst_65 = arith.constant 1.000000e+00 : f32
    %165 = vector.broadcast %cst_65 : f32 to vector<8x128xf32>
    %166 = arith.addf %165, %164 : vector<8x128xf32>
    %167 = arith.divf %165, %166 : vector<8x128xf32>
    %cst_66 = arith.constant 2.000000e+00 : f32
    %168 = vector.broadcast %cst_66 : f32 to vector<8x128xf32>
    %169 = arith.mulf %168, %167 : vector<8x128xf32>
    %cst_67 = arith.constant 1.000000e+00 : f32
    %170 = vector.broadcast %cst_67 : f32 to vector<8x128xf32>
    %171 = arith.subf %169, %170 : vector<8x128xf32>
    %172 = arith.select %5, %171, %167 : vector<8x128xi1>, vector<8x128xf32>
    %173 = vector.extract_strided_slice %172 {offsets = [0, 0], sizes = [8, 32], strides = [1, 1]} : vector<8x128xf32> to vector<8x32xf32>
    %174 = vector.extract_strided_slice %172 {offsets = [0, 32], sizes = [8, 32], strides = [1, 1]} : vector<8x128xf32> to vector<8x32xf32>
    %175 = vector.extract_strided_slice %172 {offsets = [0, 64], sizes = [8, 32], strides = [1, 1]} : vector<8x128xf32> to vector<8x32xf32>
    %176 = vector.extract_strided_slice %172 {offsets = [0, 96], sizes = [8, 32], strides = [1, 1]} : vector<8x128xf32> to vector<8x32xf32>
    %177 = arith.mulf %174, %145 : vector<8x32xf32>
    %178 = arith.mulf %173, %175 : vector<8x32xf32>
    %179 = arith.addf %177, %178 : vector<8x32xf32>
    %180 = math.tanh %179 : vector<8x32xf32>
    %181 = arith.mulf %176, %180 : vector<8x32xf32>
    %182 = arith.truncf %181 : vector<8x32xf32> to vector<8x32xbf16>
    %c0_i32_68 = arith.constant 0 : i32
    %183 = arith.addi %c0_i32_68, %c4_i32 : i32
    %184 = arith.index_cast %183 : i32 to index
    %c0_69 = arith.constant 0 : index
    %c0_70 = arith.constant 0 : index
    %185 = vector.load %arg12[%184, %c0_69, %c0_70] : memref<8x8x32xbf16, #tpu.memory_space<vmem>>, vector<1x8x32xbf16>
    %186 = vector.shape_cast %185 : vector<1x8x32xbf16> to vector<8x32xbf16>
    %187 = vector.shape_cast %182 : vector<8x32xbf16> to vector<1x8x32xbf16>
    tpu.vector_store %arg12[%184, %c0_69, %c0_70], %187 {strides = array<i32>} : memref<8x8x32xbf16, #tpu.memory_space<vmem>>, vector<1x8x32xbf16>,
    %c5_i32 = arith.constant 5 : i32
    %188 = arith.index_cast %c5_i32 : i32 to index
    %c0_71 = arith.constant 0 : index
    %c0_72 = arith.constant 0 : index
    %189 = vector.load %arg11[%188, %c0_71, %c0_72] : memref<8x8x128xf32, #tpu.memory_space<vmem>>, vector<1x8x128xf32>
    %190 = vector.shape_cast %189 : vector<1x8x128xf32> to vector<8x128xf32>
    %c0_73 = arith.constant 0 : index
    %c0_74 = arith.constant 0 : index
    %191 = vector.load %arg3[%c0_73, %c0_74] : memref<32x128xbf16, #tpu.memory_space<vmem>>, vector<32x128xbf16>
    %cst_75 = arith.constant dense<0.000000e+00> : vector<8x128xf32>
    %192 = tpu.matmul %182, %191, %cst_75 {dimension_numbers = #tpu.dot_dimension_numbers<[1], [0], [0], [1], [0, 0, 1, 1], [], []>} : vector<8x32xbf16>, vector<32x128xbf16>, vector<8x128xf32> -> vector<8x128xf32>
    %193 = arith.addf %190, %192 : vector<8x128xf32>
    %cst_76 = arith.constant 2.000000e+00 : f32
    %194 = vector.broadcast %cst_76 : f32 to vector<8x128xf32>
    %195 = arith.mulf %194, %193 : vector<8x128xf32>
    %196 = arith.select %5, %195, %193 : vector<8x128xi1>, vector<8x128xf32>
    %197 = arith.negf %196 : vector<8x128xf32>
    %198 = math.exp %197 : vector<8x128xf32>
    %cst_77 = arith.constant 1.000000e+00 : f32
    %199 = vector.broadcast %cst_77 : f32 to vector<8x128xf32>
    %200 = arith.addf %199, %198 : vector<8x128xf32>
    %201 = arith.divf %199, %200 : vector<8x128xf32>
    %cst_78 = arith.constant 2.000000e+00 : f32
    %202 = vector.broadcast %cst_78 : f32 to vector<8x128xf32>
    %203 = arith.mulf %202, %201 : vector<8x128xf32>
    %cst_79 = arith.constant 1.000000e+00 : f32
    %204 = vector.broadcast %cst_79 : f32 to vector<8x128xf32>
    %205 = arith.subf %203, %204 : vector<8x128xf32>
    %206 = arith.select %5, %205, %201 : vector<8x128xi1>, vector<8x128xf32>
    %207 = vector.extract_strided_slice %206 {offsets = [0, 0], sizes = [8, 32], strides = [1, 1]} : vector<8x128xf32> to vector<8x32xf32>
    %208 = vector.extract_strided_slice %206 {offsets = [0, 32], sizes = [8, 32], strides = [1, 1]} : vector<8x128xf32> to vector<8x32xf32>
    %209 = vector.extract_strided_slice %206 {offsets = [0, 64], sizes = [8, 32], strides = [1, 1]} : vector<8x128xf32> to vector<8x32xf32>
    %210 = vector.extract_strided_slice %206 {offsets = [0, 96], sizes = [8, 32], strides = [1, 1]} : vector<8x128xf32> to vector<8x32xf32>
    %211 = arith.mulf %208, %179 : vector<8x32xf32>
    %212 = arith.mulf %207, %209 : vector<8x32xf32>
    %213 = arith.addf %211, %212 : vector<8x32xf32>
    %214 = math.tanh %213 : vector<8x32xf32>
    %215 = arith.mulf %210, %214 : vector<8x32xf32>
    %216 = arith.truncf %215 : vector<8x32xf32> to vector<8x32xbf16>
    %c0_i32_80 = arith.constant 0 : i32
    %217 = arith.addi %c0_i32_80, %c5_i32 : i32
    %218 = arith.index_cast %217 : i32 to index
    %c0_81 = arith.constant 0 : index
    %c0_82 = arith.constant 0 : index
    %219 = vector.load %arg12[%218, %c0_81, %c0_82] : memref<8x8x32xbf16, #tpu.memory_space<vmem>>, vector<1x8x32xbf16>
    %220 = vector.shape_cast %219 : vector<1x8x32xbf16> to vector<8x32xbf16>
    %221 = vector.shape_cast %216 : vector<8x32xbf16> to vector<1x8x32xbf16>
    tpu.vector_store %arg12[%218, %c0_81, %c0_82], %221 {strides = array<i32>} : memref<8x8x32xbf16, #tpu.memory_space<vmem>>, vector<1x8x32xbf16>,
    %c6_i32 = arith.constant 6 : i32
    %222 = arith.index_cast %c6_i32 : i32 to index
    %c0_83 = arith.constant 0 : index
    %c0_84 = arith.constant 0 : index
    %223 = vector.load %arg11[%222, %c0_83, %c0_84] : memref<8x8x128xf32, #tpu.memory_space<vmem>>, vector<1x8x128xf32>
    %224 = vector.shape_cast %223 : vector<1x8x128xf32> to vector<8x128xf32>
    %c0_85 = arith.constant 0 : index
    %c0_86 = arith.constant 0 : index
    %225 = vector.load %arg3[%c0_85, %c0_86] : memref<32x128xbf16, #tpu.memory_space<vmem>>, vector<32x128xbf16>
    %cst_87 = arith.constant dense<0.000000e+00> : vector<8x128xf32>
    %226 = tpu.matmul %216, %225, %cst_87 {dimension_numbers = #tpu.dot_dimension_numbers<[1], [0], [0], [1], [0, 0, 1, 1], [], []>} : vector<8x32xbf16>, vector<32x128xbf16>, vector<8x128xf32> -> vector<8x128xf32>
    %227 = arith.addf %224, %226 : vector<8x128xf32>
    %cst_88 = arith.constant 2.000000e+00 : f32
    %228 = vector.broadcast %cst_88 : f32 to vector<8x128xf32>
    %229 = arith.mulf %228, %227 : vector<8x128xf32>
    %230 = arith.select %5, %229, %227 : vector<8x128xi1>, vector<8x128xf32>
    %231 = arith.negf %230 : vector<8x128xf32>
    %232 = math.exp %231 : vector<8x128xf32>
    %cst_89 = arith.constant 1.000000e+00 : f32
    %233 = vector.broadcast %cst_89 : f32 to vector<8x128xf32>
    %234 = arith.addf %233, %232 : vector<8x128xf32>
    %235 = arith.divf %233, %234 : vector<8x128xf32>
    %cst_90 = arith.constant 2.000000e+00 : f32
    %236 = vector.broadcast %cst_90 : f32 to vector<8x128xf32>
    %237 = arith.mulf %236, %235 : vector<8x128xf32>
    %cst_91 = arith.constant 1.000000e+00 : f32
    %238 = vector.broadcast %cst_91 : f32 to vector<8x128xf32>
    %239 = arith.subf %237, %238 : vector<8x128xf32>
    %240 = arith.select %5, %239, %235 : vector<8x128xi1>, vector<8x128xf32>
    %241 = vector.extract_strided_slice %240 {offsets = [0, 0], sizes = [8, 32], strides = [1, 1]} : vector<8x128xf32> to vector<8x32xf32>
    %242 = vector.extract_strided_slice %240 {offsets = [0, 32], sizes = [8, 32], strides = [1, 1]} : vector<8x128xf32> to vector<8x32xf32>
    %243 = vector.extract_strided_slice %240 {offsets = [0, 64], sizes = [8, 32], strides = [1, 1]} : vector<8x128xf32> to vector<8x32xf32>
    %244 = vector.extract_strided_slice %240 {offsets = [0, 96], sizes = [8, 32], strides = [1, 1]} : vector<8x128xf32> to vector<8x32xf32>
    %245 = arith.mulf %242, %213 : vector<8x32xf32>
    %246 = arith.mulf %241, %243 : vector<8x32xf32>
    %247 = arith.addf %245, %246 : vector<8x32xf32>
    %248 = math.tanh %247 : vector<8x32xf32>
    %249 = arith.mulf %244, %248 : vector<8x32xf32>
    %250 = arith.truncf %249 : vector<8x32xf32> to vector<8x32xbf16>
    %c0_i32_92 = arith.constant 0 : i32
    %251 = arith.addi %c0_i32_92, %c6_i32 : i32
    %252 = arith.index_cast %251 : i32 to index
    %c0_93 = arith.constant 0 : index
    %c0_94 = arith.constant 0 : index
    %253 = vector.load %arg12[%252, %c0_93, %c0_94] : memref<8x8x32xbf16, #tpu.memory_space<vmem>>, vector<1x8x32xbf16>
    %254 = vector.shape_cast %253 : vector<1x8x32xbf16> to vector<8x32xbf16>
    %255 = vector.shape_cast %250 : vector<8x32xbf16> to vector<1x8x32xbf16>
    tpu.vector_store %arg12[%252, %c0_93, %c0_94], %255 {strides = array<i32>} : memref<8x8x32xbf16, #tpu.memory_space<vmem>>, vector<1x8x32xbf16>,
    %c7_i32 = arith.constant 7 : i32
    %256 = arith.index_cast %c7_i32 : i32 to index
    %c0_95 = arith.constant 0 : index
    %c0_96 = arith.constant 0 : index
    %257 = vector.load %arg11[%256, %c0_95, %c0_96] : memref<8x8x128xf32, #tpu.memory_space<vmem>>, vector<1x8x128xf32>
    %258 = vector.shape_cast %257 : vector<1x8x128xf32> to vector<8x128xf32>
    %c0_97 = arith.constant 0 : index
    %c0_98 = arith.constant 0 : index
    %259 = vector.load %arg3[%c0_97, %c0_98] : memref<32x128xbf16, #tpu.memory_space<vmem>>, vector<32x128xbf16>
    %cst_99 = arith.constant dense<0.000000e+00> : vector<8x128xf32>
    %260 = tpu.matmul %250, %259, %cst_99 {dimension_numbers = #tpu.dot_dimension_numbers<[1], [0], [0], [1], [0, 0, 1, 1], [], []>} : vector<8x32xbf16>, vector<32x128xbf16>, vector<8x128xf32> -> vector<8x128xf32>
    %261 = arith.addf %258, %260 : vector<8x128xf32>
    %cst_100 = arith.constant 2.000000e+00 : f32
    %262 = vector.broadcast %cst_100 : f32 to vector<8x128xf32>
    %263 = arith.mulf %262, %261 : vector<8x128xf32>
    %264 = arith.select %5, %263, %261 : vector<8x128xi1>, vector<8x128xf32>
    %265 = arith.negf %264 : vector<8x128xf32>
    %266 = math.exp %265 : vector<8x128xf32>
    %cst_101 = arith.constant 1.000000e+00 : f32
    %267 = vector.broadcast %cst_101 : f32 to vector<8x128xf32>
    %268 = arith.addf %267, %266 : vector<8x128xf32>
    %269 = arith.divf %267, %268 : vector<8x128xf32>
    %cst_102 = arith.constant 2.000000e+00 : f32
    %270 = vector.broadcast %cst_102 : f32 to vector<8x128xf32>
    %271 = arith.mulf %270, %269 : vector<8x128xf32>
    %cst_103 = arith.constant 1.000000e+00 : f32
    %272 = vector.broadcast %cst_103 : f32 to vector<8x128xf32>
    %273 = arith.subf %271, %272 : vector<8x128xf32>
    %274 = arith.select %5, %273, %269 : vector<8x128xi1>, vector<8x128xf32>
    %275 = vector.extract_strided_slice %274 {offsets = [0, 0], sizes = [8, 32], strides = [1, 1]} : vector<8x128xf32> to vector<8x32xf32>
    %276 = vector.extract_strided_slice %274 {offsets = [0, 32], sizes = [8, 32], strides = [1, 1]} : vector<8x128xf32> to vector<8x32xf32>
    %277 = vector.extract_strided_slice %274 {offsets = [0, 64], sizes = [8, 32], strides = [1, 1]} : vector<8x128xf32> to vector<8x32xf32>
    %278 = vector.extract_strided_slice %274 {offsets = [0, 96], sizes = [8, 32], strides = [1, 1]} : vector<8x128xf32> to vector<8x32xf32>
    %279 = arith.mulf %276, %247 : vector<8x32xf32>
    %280 = arith.mulf %275, %277 : vector<8x32xf32>
    %281 = arith.addf %279, %280 : vector<8x32xf32>
    %282 = math.tanh %281 : vector<8x32xf32>
    %283 = arith.mulf %278, %282 : vector<8x32xf32>
    %284 = arith.truncf %283 : vector<8x32xf32> to vector<8x32xbf16>
    %c0_i32_104 = arith.constant 0 : i32
    %285 = arith.addi %c0_i32_104, %c7_i32 : i32
    %286 = arith.index_cast %285 : i32 to index
    %c0_105 = arith.constant 0 : index
    %c0_106 = arith.constant 0 : index
    %287 = vector.load %arg12[%286, %c0_105, %c0_106] : memref<8x8x32xbf16, #tpu.memory_space<vmem>>, vector<1x8x32xbf16>
    %288 = vector.shape_cast %287 : vector<1x8x32xbf16> to vector<8x32xbf16>
    %289 = vector.shape_cast %284 : vector<8x32xbf16> to vector<1x8x32xbf16>
    tpu.vector_store %arg12[%286, %c0_105, %c0_106], %289 {strides = array<i32>} : memref<8x8x32xbf16, #tpu.memory_space<vmem>>, vector<1x8x32xbf16>,
    %c8_i32 = arith.constant 8 : i32
    %cst_107 = arith.constant 0.000000e+00 : bf16
    %290 = vector.broadcast %cst_107 : bf16 to vector<8x32xbf16>
    %cst_108 = arith.constant 0.000000e+00 : f32
    %291 = vector.broadcast %cst_108 : f32 to vector<8x32xf32>
    %c0_109 = arith.constant 0 : index
    %c0_110 = arith.constant 0 : index
    %c0_111 = arith.constant 0 : index
    %292 = vector.load %arg12[%c0_109, %c0_110, %c0_111] : memref<8x8x32xbf16, #tpu.memory_space<vmem>>, vector<8x8x32xbf16>
    %293 = vector.shape_cast %292 : vector<8x8x32xbf16> to vector<64x32xbf16>
    %c0_112 = arith.constant 0 : index
    %c0_113 = arith.constant 0 : index
    %294 = vector.load %arg5[%c0_112, %c0_113] : memref<32x128xbf16, #tpu.memory_space<vmem>>, vector<32x128xbf16>
    %cst_114 = arith.constant dense<0.000000e+00> : vector<64x128xf32>
    %295 = tpu.matmul %293, %294, %cst_114 {dimension_numbers = #tpu.dot_dimension_numbers<[1], [0], [0], [1], [0, 0, 1, 1], [], []>} : vector<64x32xbf16>, vector<32x128xbf16>, vector<64x128xf32> -> vector<64x128xf32>
    %c0_115 = arith.constant 0 : index
    %c0_116 = arith.constant 0 : index
    %296 = vector.load %arg7[%c0_115, %c0_116] : memref<1x128xf32, #tpu.memory_space<vmem>>, vector<1x128xf32>
    %297 = vector.broadcast %296 : vector<1x128xf32> to vector<64x128xf32>
    %298 = arith.addf %295, %297 : vector<64x128xf32>
    %299 = vector.shape_cast %298 : vector<64x128xf32> to vector<8x8x128xf32>
    %c0_117 = arith.constant 0 : index
    %c0_118 = arith.constant 0 : index
    %c0_119 = arith.constant 0 : index
    %300 = vector.load %arg11[%c0_117, %c0_118, %c0_119] : memref<8x8x128xf32, #tpu.memory_space<vmem>>, vector<8x8x128xf32>
    tpu.vector_store %arg11[%c0_117, %c0_118, %c0_119], %299 {strides = array<i32>} : memref<8x8x128xf32, #tpu.memory_space<vmem>>, vector<8x8x128xf32>,
    %c0_i32_120 = arith.constant 0 : i32
    %301 = arith.index_cast %c0_i32_120 : i32 to index
    %c0_121 = arith.constant 0 : index
    %c0_122 = arith.constant 0 : index
    %302 = vector.load %arg11[%301, %c0_121, %c0_122] : memref<8x8x128xf32, #tpu.memory_space<vmem>>, vector<1x8x128xf32>
    %303 = vector.shape_cast %302 : vector<1x8x128xf32> to vector<8x128xf32>
    %c0_123 = arith.constant 0 : index
    %c0_124 = arith.constant 0 : index
    %304 = vector.load %arg6[%c0_123, %c0_124] : memref<32x128xbf16, #tpu.memory_space<vmem>>, vector<32x128xbf16>
    %cst_125 = arith.constant dense<0.000000e+00> : vector<8x128xf32>
    %305 = tpu.matmul %290, %304, %cst_125 {dimension_numbers = #tpu.dot_dimension_numbers<[1], [0], [0], [1], [0, 0, 1, 1], [], []>} : vector<8x32xbf16>, vector<32x128xbf16>, vector<8x128xf32> -> vector<8x128xf32>
    %306 = arith.addf %303, %305 : vector<8x128xf32>
    %cst_126 = arith.constant 2.000000e+00 : f32
    %307 = vector.broadcast %cst_126 : f32 to vector<8x128xf32>
    %308 = arith.mulf %307, %306 : vector<8x128xf32>
    %309 = arith.select %5, %308, %306 : vector<8x128xi1>, vector<8x128xf32>
    %310 = arith.negf %309 : vector<8x128xf32>
    %311 = math.exp %310 : vector<8x128xf32>
    %cst_127 = arith.constant 1.000000e+00 : f32
    %312 = vector.broadcast %cst_127 : f32 to vector<8x128xf32>
    %313 = arith.addf %312, %311 : vector<8x128xf32>
    %314 = arith.divf %312, %313 : vector<8x128xf32>
    %cst_128 = arith.constant 2.000000e+00 : f32
    %315 = vector.broadcast %cst_128 : f32 to vector<8x128xf32>
    %316 = arith.mulf %315, %314 : vector<8x128xf32>
    %cst_129 = arith.constant 1.000000e+00 : f32
    %317 = vector.broadcast %cst_129 : f32 to vector<8x128xf32>
    %318 = arith.subf %316, %317 : vector<8x128xf32>
    %319 = arith.select %5, %318, %314 : vector<8x128xi1>, vector<8x128xf32>
    %320 = vector.extract_strided_slice %319 {offsets = [0, 0], sizes = [8, 32], strides = [1, 1]} : vector<8x128xf32> to vector<8x32xf32>
    %321 = vector.extract_strided_slice %319 {offsets = [0, 32], sizes = [8, 32], strides = [1, 1]} : vector<8x128xf32> to vector<8x32xf32>
    %322 = vector.extract_strided_slice %319 {offsets = [0, 64], sizes = [8, 32], strides = [1, 1]} : vector<8x128xf32> to vector<8x32xf32>
    %323 = vector.extract_strided_slice %319 {offsets = [0, 96], sizes = [8, 32], strides = [1, 1]} : vector<8x128xf32> to vector<8x32xf32>
    %324 = arith.mulf %321, %291 : vector<8x32xf32>
    %325 = arith.mulf %320, %322 : vector<8x32xf32>
    %326 = arith.addf %324, %325 : vector<8x32xf32>
    %327 = math.tanh %326 : vector<8x32xf32>
    %328 = arith.mulf %323, %327 : vector<8x32xf32>
    %329 = arith.truncf %328 : vector<8x32xf32> to vector<8x32xbf16>
    %c1_i32_130 = arith.constant 1 : i32
    %330 = arith.index_cast %c1_i32_130 : i32 to index
    %c0_131 = arith.constant 0 : index
    %c0_132 = arith.constant 0 : index
    %331 = vector.load %arg11[%330, %c0_131, %c0_132] : memref<8x8x128xf32, #tpu.memory_space<vmem>>, vector<1x8x128xf32>
    %332 = vector.shape_cast %331 : vector<1x8x128xf32> to vector<8x128xf32>
    %c0_133 = arith.constant 0 : index
    %c0_134 = arith.constant 0 : index
    %333 = vector.load %arg6[%c0_133, %c0_134] : memref<32x128xbf16, #tpu.memory_space<vmem>>, vector<32x128xbf16>
    %cst_135 = arith.constant dense<0.000000e+00> : vector<8x128xf32>
    %334 = tpu.matmul %329, %333, %cst_135 {dimension_numbers = #tpu.dot_dimension_numbers<[1], [0], [0], [1], [0, 0, 1, 1], [], []>} : vector<8x32xbf16>, vector<32x128xbf16>, vector<8x128xf32> -> vector<8x128xf32>
    %335 = arith.addf %332, %334 : vector<8x128xf32>
    %cst_136 = arith.constant 2.000000e+00 : f32
    %336 = vector.broadcast %cst_136 : f32 to vector<8x128xf32>
    %337 = arith.mulf %336, %335 : vector<8x128xf32>
    %338 = arith.select %5, %337, %335 : vector<8x128xi1>, vector<8x128xf32>
    %339 = arith.negf %338 : vector<8x128xf32>
    %340 = math.exp %339 : vector<8x128xf32>
    %cst_137 = arith.constant 1.000000e+00 : f32
    %341 = vector.broadcast %cst_137 : f32 to vector<8x128xf32>
    %342 = arith.addf %341, %340 : vector<8x128xf32>
    %343 = arith.divf %341, %342 : vector<8x128xf32>
    %cst_138 = arith.constant 2.000000e+00 : f32
    %344 = vector.broadcast %cst_138 : f32 to vector<8x128xf32>
    %345 = arith.mulf %344, %343 : vector<8x128xf32>
    %cst_139 = arith.constant 1.000000e+00 : f32
    %346 = vector.broadcast %cst_139 : f32 to vector<8x128xf32>
    %347 = arith.subf %345, %346 : vector<8x128xf32>
    %348 = arith.select %5, %347, %343 : vector<8x128xi1>, vector<8x128xf32>
    %349 = vector.extract_strided_slice %348 {offsets = [0, 0], sizes = [8, 32], strides = [1, 1]} : vector<8x128xf32> to vector<8x32xf32>
    %350 = vector.extract_strided_slice %348 {offsets = [0, 32], sizes = [8, 32], strides = [1, 1]} : vector<8x128xf32> to vector<8x32xf32>
    %351 = vector.extract_strided_slice %348 {offsets = [0, 64], sizes = [8, 32], strides = [1, 1]} : vector<8x128xf32> to vector<8x32xf32>
    %352 = vector.extract_strided_slice %348 {offsets = [0, 96], sizes = [8, 32], strides = [1, 1]} : vector<8x128xf32> to vector<8x32xf32>
    %353 = arith.mulf %350, %326 : vector<8x32xf32>
    %354 = arith.mulf %349, %351 : vector<8x32xf32>
    %355 = arith.addf %353, %354 : vector<8x32xf32>
    %356 = math.tanh %355 : vector<8x32xf32>
    %357 = arith.mulf %352, %356 : vector<8x32xf32>
    %358 = arith.truncf %357 : vector<8x32xf32> to vector<8x32xbf16>
    %c2_i32_140 = arith.constant 2 : i32
    %359 = arith.index_cast %c2_i32_140 : i32 to index
    %c0_141 = arith.constant 0 : index
    %c0_142 = arith.constant 0 : index
    %360 = vector.load %arg11[%359, %c0_141, %c0_142] : memref<8x8x128xf32, #tpu.memory_space<vmem>>, vector<1x8x128xf32>
    %361 = vector.shape_cast %360 : vector<1x8x128xf32> to vector<8x128xf32>
    %c0_143 = arith.constant 0 : index
    %c0_144 = arith.constant 0 : index
    %362 = vector.load %arg6[%c0_143, %c0_144] : memref<32x128xbf16, #tpu.memory_space<vmem>>, vector<32x128xbf16>
    %cst_145 = arith.constant dense<0.000000e+00> : vector<8x128xf32>
    %363 = tpu.matmul %358, %362, %cst_145 {dimension_numbers = #tpu.dot_dimension_numbers<[1], [0], [0], [1], [0, 0, 1, 1], [], []>} : vector<8x32xbf16>, vector<32x128xbf16>, vector<8x128xf32> -> vector<8x128xf32>
    %364 = arith.addf %361, %363 : vector<8x128xf32>
    %cst_146 = arith.constant 2.000000e+00 : f32
    %365 = vector.broadcast %cst_146 : f32 to vector<8x128xf32>
    %366 = arith.mulf %365, %364 : vector<8x128xf32>
    %367 = arith.select %5, %366, %364 : vector<8x128xi1>, vector<8x128xf32>
    %368 = arith.negf %367 : vector<8x128xf32>
    %369 = math.exp %368 : vector<8x128xf32>
    %cst_147 = arith.constant 1.000000e+00 : f32
    %370 = vector.broadcast %cst_147 : f32 to vector<8x128xf32>
    %371 = arith.addf %370, %369 : vector<8x128xf32>
    %372 = arith.divf %370, %371 : vector<8x128xf32>
    %cst_148 = arith.constant 2.000000e+00 : f32
    %373 = vector.broadcast %cst_148 : f32 to vector<8x128xf32>
    %374 = arith.mulf %373, %372 : vector<8x128xf32>
    %cst_149 = arith.constant 1.000000e+00 : f32
    %375 = vector.broadcast %cst_149 : f32 to vector<8x128xf32>
    %376 = arith.subf %374, %375 : vector<8x128xf32>
    %377 = arith.select %5, %376, %372 : vector<8x128xi1>, vector<8x128xf32>
    %378 = vector.extract_strided_slice %377 {offsets = [0, 0], sizes = [8, 32], strides = [1, 1]} : vector<8x128xf32> to vector<8x32xf32>
    %379 = vector.extract_strided_slice %377 {offsets = [0, 32], sizes = [8, 32], strides = [1, 1]} : vector<8x128xf32> to vector<8x32xf32>
    %380 = vector.extract_strided_slice %377 {offsets = [0, 64], sizes = [8, 32], strides = [1, 1]} : vector<8x128xf32> to vector<8x32xf32>
    %381 = vector.extract_strided_slice %377 {offsets = [0, 96], sizes = [8, 32], strides = [1, 1]} : vector<8x128xf32> to vector<8x32xf32>
    %382 = arith.mulf %379, %355 : vector<8x32xf32>
    %383 = arith.mulf %378, %380 : vector<8x32xf32>
    %384 = arith.addf %382, %383 : vector<8x32xf32>
    %385 = math.tanh %384 : vector<8x32xf32>
    %386 = arith.mulf %381, %385 : vector<8x32xf32>
    %387 = arith.truncf %386 : vector<8x32xf32> to vector<8x32xbf16>
    %c3_i32_150 = arith.constant 3 : i32
    %388 = arith.index_cast %c3_i32_150 : i32 to index
    %c0_151 = arith.constant 0 : index
    %c0_152 = arith.constant 0 : index
    %389 = vector.load %arg11[%388, %c0_151, %c0_152] : memref<8x8x128xf32, #tpu.memory_space<vmem>>, vector<1x8x128xf32>
    %390 = vector.shape_cast %389 : vector<1x8x128xf32> to vector<8x128xf32>
    %c0_153 = arith.constant 0 : index
    %c0_154 = arith.constant 0 : index
    %391 = vector.load %arg6[%c0_153, %c0_154] : memref<32x128xbf16, #tpu.memory_space<vmem>>, vector<32x128xbf16>
    %cst_155 = arith.constant dense<0.000000e+00> : vector<8x128xf32>
    %392 = tpu.matmul %387, %391, %cst_155 {dimension_numbers = #tpu.dot_dimension_numbers<[1], [0], [0], [1], [0, 0, 1, 1], [], []>} : vector<8x32xbf16>, vector<32x128xbf16>, vector<8x128xf32> -> vector<8x128xf32>
    %393 = arith.addf %390, %392 : vector<8x128xf32>
    %cst_156 = arith.constant 2.000000e+00 : f32
    %394 = vector.broadcast %cst_156 : f32 to vector<8x128xf32>
    %395 = arith.mulf %394, %393 : vector<8x128xf32>
    %396 = arith.select %5, %395, %393 : vector<8x128xi1>, vector<8x128xf32>
    %397 = arith.negf %396 : vector<8x128xf32>
    %398 = math.exp %397 : vector<8x128xf32>
    %cst_157 = arith.constant 1.000000e+00 : f32
    %399 = vector.broadcast %cst_157 : f32 to vector<8x128xf32>
    %400 = arith.addf %399, %398 : vector<8x128xf32>
    %401 = arith.divf %399, %400 : vector<8x128xf32>
    %cst_158 = arith.constant 2.000000e+00 : f32
    %402 = vector.broadcast %cst_158 : f32 to vector<8x128xf32>
    %403 = arith.mulf %402, %401 : vector<8x128xf32>
    %cst_159 = arith.constant 1.000000e+00 : f32
    %404 = vector.broadcast %cst_159 : f32 to vector<8x128xf32>
    %405 = arith.subf %403, %404 : vector<8x128xf32>
    %406 = arith.select %5, %405, %401 : vector<8x128xi1>, vector<8x128xf32>
    %407 = vector.extract_strided_slice %406 {offsets = [0, 0], sizes = [8, 32], strides = [1, 1]} : vector<8x128xf32> to vector<8x32xf32>
    %408 = vector.extract_strided_slice %406 {offsets = [0, 32], sizes = [8, 32], strides = [1, 1]} : vector<8x128xf32> to vector<8x32xf32>
    %409 = vector.extract_strided_slice %406 {offsets = [0, 64], sizes = [8, 32], strides = [1, 1]} : vector<8x128xf32> to vector<8x32xf32>
    %410 = vector.extract_strided_slice %406 {offsets = [0, 96], sizes = [8, 32], strides = [1, 1]} : vector<8x128xf32> to vector<8x32xf32>
    %411 = arith.mulf %408, %384 : vector<8x32xf32>
    %412 = arith.mulf %407, %409 : vector<8x32xf32>
    %413 = arith.addf %411, %412 : vector<8x32xf32>
    %414 = math.tanh %413 : vector<8x32xf32>
    %415 = arith.mulf %410, %414 : vector<8x32xf32>
    %416 = arith.truncf %415 : vector<8x32xf32> to vector<8x32xbf16>
    %c4_i32_160 = arith.constant 4 : i32
    %417 = arith.index_cast %c4_i32_160 : i32 to index
    %c0_161 = arith.constant 0 : index
    %c0_162 = arith.constant 0 : index
    %418 = vector.load %arg11[%417, %c0_161, %c0_162] : memref<8x8x128xf32, #tpu.memory_space<vmem>>, vector<1x8x128xf32>
    %419 = vector.shape_cast %418 : vector<1x8x128xf32> to vector<8x128xf32>
    %c0_163 = arith.constant 0 : index
    %c0_164 = arith.constant 0 : index
    %420 = vector.load %arg6[%c0_163, %c0_164] : memref<32x128xbf16, #tpu.memory_space<vmem>>, vector<32x128xbf16>
    %cst_165 = arith.constant dense<0.000000e+00> : vector<8x128xf32>
    %421 = tpu.matmul %416, %420, %cst_165 {dimension_numbers = #tpu.dot_dimension_numbers<[1], [0], [0], [1], [0, 0, 1, 1], [], []>} : vector<8x32xbf16>, vector<32x128xbf16>, vector<8x128xf32> -> vector<8x128xf32>
    %422 = arith.addf %419, %421 : vector<8x128xf32>
    %cst_166 = arith.constant 2.000000e+00 : f32
    %423 = vector.broadcast %cst_166 : f32 to vector<8x128xf32>
    %424 = arith.mulf %423, %422 : vector<8x128xf32>
    %425 = arith.select %5, %424, %422 : vector<8x128xi1>, vector<8x128xf32>
    %426 = arith.negf %425 : vector<8x128xf32>
    %427 = math.exp %426 : vector<8x128xf32>
    %cst_167 = arith.constant 1.000000e+00 : f32
    %428 = vector.broadcast %cst_167 : f32 to vector<8x128xf32>
    %429 = arith.addf %428, %427 : vector<8x128xf32>
    %430 = arith.divf %428, %429 : vector<8x128xf32>
    %cst_168 = arith.constant 2.000000e+00 : f32
    %431 = vector.broadcast %cst_168 : f32 to vector<8x128xf32>
    %432 = arith.mulf %431, %430 : vector<8x128xf32>
    %cst_169 = arith.constant 1.000000e+00 : f32
    %433 = vector.broadcast %cst_169 : f32 to vector<8x128xf32>
    %434 = arith.subf %432, %433 : vector<8x128xf32>
    %435 = arith.select %5, %434, %430 : vector<8x128xi1>, vector<8x128xf32>
    %436 = vector.extract_strided_slice %435 {offsets = [0, 0], sizes = [8, 32], strides = [1, 1]} : vector<8x128xf32> to vector<8x32xf32>
    %437 = vector.extract_strided_slice %435 {offsets = [0, 32], sizes = [8, 32], strides = [1, 1]} : vector<8x128xf32> to vector<8x32xf32>
    %438 = vector.extract_strided_slice %435 {offsets = [0, 64], sizes = [8, 32], strides = [1, 1]} : vector<8x128xf32> to vector<8x32xf32>
    %439 = vector.extract_strided_slice %435 {offsets = [0, 96], sizes = [8, 32], strides = [1, 1]} : vector<8x128xf32> to vector<8x32xf32>
    %440 = arith.mulf %437, %413 : vector<8x32xf32>
    %441 = arith.mulf %436, %438 : vector<8x32xf32>
    %442 = arith.addf %440, %441 : vector<8x32xf32>
    %443 = math.tanh %442 : vector<8x32xf32>
    %444 = arith.mulf %439, %443 : vector<8x32xf32>
    %445 = arith.truncf %444 : vector<8x32xf32> to vector<8x32xbf16>
    %c5_i32_170 = arith.constant 5 : i32
    %446 = arith.index_cast %c5_i32_170 : i32 to index
    %c0_171 = arith.constant 0 : index
    %c0_172 = arith.constant 0 : index
    %447 = vector.load %arg11[%446, %c0_171, %c0_172] : memref<8x8x128xf32, #tpu.memory_space<vmem>>, vector<1x8x128xf32>
    %448 = vector.shape_cast %447 : vector<1x8x128xf32> to vector<8x128xf32>
    %c0_173 = arith.constant 0 : index
    %c0_174 = arith.constant 0 : index
    %449 = vector.load %arg6[%c0_173, %c0_174] : memref<32x128xbf16, #tpu.memory_space<vmem>>, vector<32x128xbf16>
    %cst_175 = arith.constant dense<0.000000e+00> : vector<8x128xf32>
    %450 = tpu.matmul %445, %449, %cst_175 {dimension_numbers = #tpu.dot_dimension_numbers<[1], [0], [0], [1], [0, 0, 1, 1], [], []>} : vector<8x32xbf16>, vector<32x128xbf16>, vector<8x128xf32> -> vector<8x128xf32>
    %451 = arith.addf %448, %450 : vector<8x128xf32>
    %cst_176 = arith.constant 2.000000e+00 : f32
    %452 = vector.broadcast %cst_176 : f32 to vector<8x128xf32>
    %453 = arith.mulf %452, %451 : vector<8x128xf32>
    %454 = arith.select %5, %453, %451 : vector<8x128xi1>, vector<8x128xf32>
    %455 = arith.negf %454 : vector<8x128xf32>
    %456 = math.exp %455 : vector<8x128xf32>
    %cst_177 = arith.constant 1.000000e+00 : f32
    %457 = vector.broadcast %cst_177 : f32 to vector<8x128xf32>
    %458 = arith.addf %457, %456 : vector<8x128xf32>
    %459 = arith.divf %457, %458 : vector<8x128xf32>
    %cst_178 = arith.constant 2.000000e+00 : f32
    %460 = vector.broadcast %cst_178 : f32 to vector<8x128xf32>
    %461 = arith.mulf %460, %459 : vector<8x128xf32>
    %cst_179 = arith.constant 1.000000e+00 : f32
    %462 = vector.broadcast %cst_179 : f32 to vector<8x128xf32>
    %463 = arith.subf %461, %462 : vector<8x128xf32>
    %464 = arith.select %5, %463, %459 : vector<8x128xi1>, vector<8x128xf32>
    %465 = vector.extract_strided_slice %464 {offsets = [0, 0], sizes = [8, 32], strides = [1, 1]} : vector<8x128xf32> to vector<8x32xf32>
    %466 = vector.extract_strided_slice %464 {offsets = [0, 32], sizes = [8, 32], strides = [1, 1]} : vector<8x128xf32> to vector<8x32xf32>
    %467 = vector.extract_strided_slice %464 {offsets = [0, 64], sizes = [8, 32], strides = [1, 1]} : vector<8x128xf32> to vector<8x32xf32>
    %468 = vector.extract_strided_slice %464 {offsets = [0, 96], sizes = [8, 32], strides = [1, 1]} : vector<8x128xf32> to vector<8x32xf32>
    %469 = arith.mulf %466, %442 : vector<8x32xf32>
    %470 = arith.mulf %465, %467 : vector<8x32xf32>
    %471 = arith.addf %469, %470 : vector<8x32xf32>
    %472 = math.tanh %471 : vector<8x32xf32>
    %473 = arith.mulf %468, %472 : vector<8x32xf32>
    %474 = arith.truncf %473 : vector<8x32xf32> to vector<8x32xbf16>
    %c6_i32_180 = arith.constant 6 : i32
    %475 = arith.index_cast %c6_i32_180 : i32 to index
    %c0_181 = arith.constant 0 : index
    %c0_182 = arith.constant 0 : index
    %476 = vector.load %arg11[%475, %c0_181, %c0_182] : memref<8x8x128xf32, #tpu.memory_space<vmem>>, vector<1x8x128xf32>
    %477 = vector.shape_cast %476 : vector<1x8x128xf32> to vector<8x128xf32>
    %c0_183 = arith.constant 0 : index
    %c0_184 = arith.constant 0 : index
    %478 = vector.load %arg6[%c0_183, %c0_184] : memref<32x128xbf16, #tpu.memory_space<vmem>>, vector<32x128xbf16>
    %cst_185 = arith.constant dense<0.000000e+00> : vector<8x128xf32>
    %479 = tpu.matmul %474, %478, %cst_185 {dimension_numbers = #tpu.dot_dimension_numbers<[1], [0], [0], [1], [0, 0, 1, 1], [], []>} : vector<8x32xbf16>, vector<32x128xbf16>, vector<8x128xf32> -> vector<8x128xf32>
    %480 = arith.addf %477, %479 : vector<8x128xf32>
    %cst_186 = arith.constant 2.000000e+00 : f32
    %481 = vector.broadcast %cst_186 : f32 to vector<8x128xf32>
    %482 = arith.mulf %481, %480 : vector<8x128xf32>
    %483 = arith.select %5, %482, %480 : vector<8x128xi1>, vector<8x128xf32>
    %484 = arith.negf %483 : vector<8x128xf32>
    %485 = math.exp %484 : vector<8x128xf32>
    %cst_187 = arith.constant 1.000000e+00 : f32
    %486 = vector.broadcast %cst_187 : f32 to vector<8x128xf32>
    %487 = arith.addf %486, %485 : vector<8x128xf32>
    %488 = arith.divf %486, %487 : vector<8x128xf32>
    %cst_188 = arith.constant 2.000000e+00 : f32
    %489 = vector.broadcast %cst_188 : f32 to vector<8x128xf32>
    %490 = arith.mulf %489, %488 : vector<8x128xf32>
    %cst_189 = arith.constant 1.000000e+00 : f32
    %491 = vector.broadcast %cst_189 : f32 to vector<8x128xf32>
    %492 = arith.subf %490, %491 : vector<8x128xf32>
    %493 = arith.select %5, %492, %488 : vector<8x128xi1>, vector<8x128xf32>
    %494 = vector.extract_strided_slice %493 {offsets = [0, 0], sizes = [8, 32], strides = [1, 1]} : vector<8x128xf32> to vector<8x32xf32>
    %495 = vector.extract_strided_slice %493 {offsets = [0, 32], sizes = [8, 32], strides = [1, 1]} : vector<8x128xf32> to vector<8x32xf32>
    %496 = vector.extract_strided_slice %493 {offsets = [0, 64], sizes = [8, 32], strides = [1, 1]} : vector<8x128xf32> to vector<8x32xf32>
    %497 = vector.extract_strided_slice %493 {offsets = [0, 96], sizes = [8, 32], strides = [1, 1]} : vector<8x128xf32> to vector<8x32xf32>
    %498 = arith.mulf %495, %471 : vector<8x32xf32>
    %499 = arith.mulf %494, %496 : vector<8x32xf32>
    %500 = arith.addf %498, %499 : vector<8x32xf32>
    %501 = math.tanh %500 : vector<8x32xf32>
    %502 = arith.mulf %497, %501 : vector<8x32xf32>
    %503 = arith.truncf %502 : vector<8x32xf32> to vector<8x32xbf16>
    %c7_i32_190 = arith.constant 7 : i32
    %504 = arith.index_cast %c7_i32_190 : i32 to index
    %c0_191 = arith.constant 0 : index
    %c0_192 = arith.constant 0 : index
    %505 = vector.load %arg11[%504, %c0_191, %c0_192] : memref<8x8x128xf32, #tpu.memory_space<vmem>>, vector<1x8x128xf32>
    %506 = vector.shape_cast %505 : vector<1x8x128xf32> to vector<8x128xf32>
    %c0_193 = arith.constant 0 : index
    %c0_194 = arith.constant 0 : index
    %507 = vector.load %arg6[%c0_193, %c0_194] : memref<32x128xbf16, #tpu.memory_space<vmem>>, vector<32x128xbf16>
    %cst_195 = arith.constant dense<0.000000e+00> : vector<8x128xf32>
    %508 = tpu.matmul %503, %507, %cst_195 {dimension_numbers = #tpu.dot_dimension_numbers<[1], [0], [0], [1], [0, 0, 1, 1], [], []>} : vector<8x32xbf16>, vector<32x128xbf16>, vector<8x128xf32> -> vector<8x128xf32>
    %509 = arith.addf %506, %508 : vector<8x128xf32>
    %cst_196 = arith.constant 2.000000e+00 : f32
    %510 = vector.broadcast %cst_196 : f32 to vector<8x128xf32>
    %511 = arith.mulf %510, %509 : vector<8x128xf32>
    %512 = arith.select %5, %511, %509 : vector<8x128xi1>, vector<8x128xf32>
    %513 = arith.negf %512 : vector<8x128xf32>
    %514 = math.exp %513 : vector<8x128xf32>
    %cst_197 = arith.constant 1.000000e+00 : f32
    %515 = vector.broadcast %cst_197 : f32 to vector<8x128xf32>
    %516 = arith.addf %515, %514 : vector<8x128xf32>
    %517 = arith.divf %515, %516 : vector<8x128xf32>
    %cst_198 = arith.constant 2.000000e+00 : f32
    %518 = vector.broadcast %cst_198 : f32 to vector<8x128xf32>
    %519 = arith.mulf %518, %517 : vector<8x128xf32>
    %cst_199 = arith.constant 1.000000e+00 : f32
    %520 = vector.broadcast %cst_199 : f32 to vector<8x128xf32>
    %521 = arith.subf %519, %520 : vector<8x128xf32>
    %522 = arith.select %5, %521, %517 : vector<8x128xi1>, vector<8x128xf32>
    %523 = vector.extract_strided_slice %522 {offsets = [0, 0], sizes = [8, 32], strides = [1, 1]} : vector<8x128xf32> to vector<8x32xf32>
    %524 = vector.extract_strided_slice %522 {offsets = [0, 32], sizes = [8, 32], strides = [1, 1]} : vector<8x128xf32> to vector<8x32xf32>
    %525 = vector.extract_strided_slice %522 {offsets = [0, 64], sizes = [8, 32], strides = [1, 1]} : vector<8x128xf32> to vector<8x32xf32>
    %526 = vector.extract_strided_slice %522 {offsets = [0, 96], sizes = [8, 32], strides = [1, 1]} : vector<8x128xf32> to vector<8x32xf32>
    %527 = arith.mulf %524, %500 : vector<8x32xf32>
    %528 = arith.mulf %523, %525 : vector<8x32xf32>
    %529 = arith.addf %527, %528 : vector<8x32xf32>
    %530 = math.tanh %529 : vector<8x32xf32>
    %531 = arith.mulf %526, %530 : vector<8x32xf32>
    %532 = arith.truncf %531 : vector<8x32xf32> to vector<8x32xbf16>
    %c8_i32_200 = arith.constant 8 : i32
    %c0_201 = arith.constant 0 : index
    %c0_202 = arith.constant 0 : index
    %533 = vector.load %arg8[%c0_201, %c0_202] : memref<32x128xbf16, #tpu.memory_space<vmem>>, vector<32x128xbf16>
    %cst_203 = arith.constant dense<0.000000e+00> : vector<8x128xf32>
    %534 = tpu.matmul %532, %533, %cst_203 {dimension_numbers = #tpu.dot_dimension_numbers<[1], [0], [0], [1], [0, 0, 1, 1], [], []>} : vector<8x32xbf16>, vector<32x128xbf16>, vector<8x128xf32> -> vector<8x128xf32>
    %c0_204 = arith.constant 0 : index
    %c0_205 = arith.constant 0 : index
    %535 = vector.load %arg9[%c0_204, %c0_205] : memref<1x128xf32, #tpu.memory_space<vmem>>, vector<1x128xf32>
    %536 = vector.broadcast %535 : vector<1x128xf32> to vector<8x128xf32>
    %537 = arith.addf %534, %536 : vector<8x128xf32>
    %c0_206 = arith.constant 0 : index
    %c0_207 = arith.constant 0 : index
    %538 = vector.load %arg10[%c0_206, %c0_207] : memref<8x128xf32, #tpu.memory_space<vmem>>, vector<8x128xf32>
    tpu.vector_store %arg10[%c0_206, %c0_207], %537 {strides = array<i32>} : memref<8x128xf32, #tpu.memory_space<vmem>>, vector<8x128xf32>,
    return
  }
  func.func @transform_0(%arg0: i32) -> (i32, i32, i32) {
    %c0_i32 = arith.constant 0 : i32
    %c0_i32_0 = arith.constant 0 : i32
    %c0_i32_1 = arith.constant 0 : i32
    return %c0_i32, %arg0, %c0_i32_0 : i32, i32, i32
  }
  func.func @transform_1(%arg0: i32) -> (i32, i32) {
    %c0_i32 = arith.constant 0 : i32
    %c0_i32_0 = arith.constant 0 : i32
    %c0_i32_1 = arith.constant 0 : i32
    return %c0_i32, %c0_i32_0 : i32, i32
  }
  func.func @transform_2(%arg0: i32) -> (i32, i32) {
    %c0_i32 = arith.constant 0 : i32
    %c0_i32_0 = arith.constant 0 : i32
    %c0_i32_1 = arith.constant 0 : i32
    return %c0_i32, %c0_i32_0 : i32, i32
  }
  func.func @transform_3(%arg0: i32) -> (i32, i32) {
    %c0_i32 = arith.constant 0 : i32
    %c0_i32_0 = arith.constant 0 : i32
    %c0_i32_1 = arith.constant 0 : i32
    return %c0_i32, %c0_i32_0 : i32, i32
  }
  func.func @transform_4(%arg0: i32) -> (i32, i32) {
    %c0_i32 = arith.constant 0 : i32
    %c0_i32_0 = arith.constant 0 : i32
    %c0_i32_1 = arith.constant 0 : i32
    return %c0_i32, %c0_i32_0 : i32, i32
  }
  func.func @transform_5(%arg0: i32) -> (i32, i32) {
    %c0_i32 = arith.constant 0 : i32
    %c0_i32_0 = arith.constant 0 : i32
    %c0_i32_1 = arith.constant 0 : i32
    return %c0_i32, %c0_i32_0 : i32, i32
  }
  func.func @transform_6(%arg0: i32) -> (i32, i32) {
    %c0_i32 = arith.constant 0 : i32
    %c0_i32_0 = arith.constant 0 : i32
    %c0_i32_1 = arith.constant 0 : i32
    return %c0_i32, %c0_i32_0 : i32, i32
  }
  func.func @transform_7(%arg0: i32) -> (i32, i32) {
    %c0_i32 = arith.constant 0 : i32
    %c0_i32_0 = arith.constant 0 : i32
    %c0_i32_1 = arith.constant 0 : i32
    return %c0_i32, %c0_i32_0 : i32, i32
  }
  func.func @transform_8(%arg0: i32) -> (i32, i32) {
    %c0_i32 = arith.constant 0 : i32
    %c0_i32_0 = arith.constant 0 : i32
    %c0_i32_1 = arith.constant 0 : i32
    return %c0_i32, %c0_i32_0 : i32, i32
  }
  func.func @transform_9(%arg0: i32) -> (i32, i32) {
    %c0_i32 = arith.constant 0 : i32
    %c0_i32_0 = arith.constant 0 : i32
    return %arg0, %c0_i32 : i32, i32
  }
}

</mosaic_0001>

<bundles_post_ra>
// kernel: tpu_custom_call.1
= control target key start
LH: loop header
LB: loop body
LE: loop exit
PB: predicated region body
PF: predicated region fallthrough
CT: control target
= control target key end

     0   :  { %14 = vsyncpa [#allocation5], 0  ;;  %s2423_s0 = inlined_call_operand.hbm [shape: f32[8,8,16], index: 0, kind: input, shape index: {}]   ;;  %s2424_s1 = inlined_call_operand.hbm [shape: bf16[16,128], index: 1, kind: input, shape index: {}]   ;;  %s2425_s2 = inlined_call_operand.hbm [shape: bf16[32,128], index: 2, kind: input, shape index: {}]   ;;  %s2426_s3 = inlined_call_operand.vmem [shape: f32[1,128], index: 3, kind: input, shape index: {}]   ;;  %s2427_s4 = inlined_call_operand.hbm [shape: bf16[32,128], index: 4, kind: input, shape index: {}]   ;;  %s2428_s5 = inlined_call_operand.hbm [shape: bf16[32,128], index: 5, kind: input, shape index: {}]   ;;  %s2429_s6 = inlined_call_operand.vmem [shape: f32[1,128], index: 6, kind: input, shape index: {}]   ;;  %s2430_s7 = inlined_call_operand.hbm [shape: bf16[32,128], index: 7, kind: input, shape index: {}]   ;;  %s2431_s8 = inlined_call_operand.vmem [shape: f32[1,128], index: 8, kind: input, shape index: {}]   ;;  %s2432_s9 = inlined_call_operand.hbm [shape: f32[8,128], index: 9, kind: output, shape index: {}]  }
   0x1   :  { %15 = vsyncpa [#allocation8], 0 }
   0x2   :  { %16 = vsyncpa [#allocation11], 0 }
   0x3   :  { %17 = vsyncpa [#allocation14], 0  ;;  %s36_s11 = sshll.u32 %s2424_s1, 4  ;;  %s37_s11 = int_to_ptr.hbm [resolvable:$true] %s36_s11 }
   0x4   :  { %18 = vsyncpa [#allocation6], 0  ;;  %s2051_s12 = smov [#allocation7]   ;;  %s64_s16 = sshll.u32 %s2427_s4, 4  ;;  %s65_s16 = int_to_ptr.hbm [resolvable:$true] %s64_s16 }
   0x5   :  { %s38_s13 = sshll.u32 %s2051_s12, 4  ;;  %s2052_s17 = smov 64   ;;  %s39_s13 = int_to_ptr.vmem [resolvable:$true] %s38_s13 }
   0x6   :  { %s2053_s18 = smov 4   ;;  %s2054_s19 = smov [#allocation10]  }
   0x7   :  { %44 = dma.hbm_to_vmem [thread:$0]  %s37_s11, 128, %s39_s13, [#allocation8], %s2052_s17, %s2052_s17, %s2053_s18  }
   0x8   :  { %s66_s20 = sshll.u32 %s2054_s19, 4  ;;  %s23_s22 = sshll.u32 %s2423_s0, 4  ;;  %s67_s20 = int_to_ptr.vmem [resolvable:$true] %s66_s20  ;;  %s24_s22 = int_to_ptr.hbm [resolvable:$true] %s23_s22 }
   0x9   :  { %72 = dma.hbm_to_vmem [thread:$0]  %s65_s16, 256, %s67_s20, [#allocation11], %s2052_s17, %s2052_s17, %s2053_s18  }
   0xa   :  { %s2055_s4 = smov [#allocation4]   ;;  %s49_s26 = sshll.u32 %s2425_s2, 4  ;;  %s50_s26 = int_to_ptr.hbm [resolvable:$true] %s49_s26 }
   0xb   :  { %s25_s23 = sshll.u32 %s2055_s4, 4  ;;  %s2056_s27 = smov 128   ;;  %s26_s23 = int_to_ptr.vmem [resolvable:$true] %s25_s23 }
   0xc   :  { %s2057_s28 = smov 8   ;;  %s2058_s29 = smov [#allocation9]  }
   0xd   :  { %31 = dma.hbm_to_vmem [thread:$0]  %s24_s22, 1024, %s26_s23, [#allocation5], %s2056_s27, %s2056_s27, %s2057_s28  }
   0xe   :  { %s51_s30 = sshll.u32 %s2058_s29, 4  ;;  %s77_s11 = sshll.u32 %s2428_s5, 4  ;;  %s52_s30 = int_to_ptr.vmem [resolvable:$true] %s51_s30  ;;  %s78_s11 = int_to_ptr.hbm [resolvable:$true] %s77_s11 }
   0xf   :  { %57 = dma.hbm_to_vmem [thread:$0]  %s50_s26, 256, %s52_s30, [#allocation8], %s2052_s17, %s2052_s17, %s2053_s18  }
  0x10   :  { %s92_s2 = sshll.u32 %s2430_s7, 4  ;;  %s2059_s14 = smov [#allocation12]   ;;  %s93_s2 = int_to_ptr.hbm [resolvable:$true] %s92_s2 }
  0x11   :  { %s79_s15 = sshll.u32 %s2059_s14, 4  ;;  %s2060_s16 = smov [#allocation13]   ;;  %s80_s15 = int_to_ptr.vmem [resolvable:$true] %s79_s15 }
  0x12   :  { %85 = dma.hbm_to_vmem [thread:$0]  %s78_s11, 256, %s80_s15, [#allocation11], %s2052_s17, %s2052_s17, %s2053_s18  }
  0x13   :  { %s94_s5 = sshll.u32 %s2060_s16, 4  ;;  %s95_s5 = int_to_ptr.vmem [resolvable:$true] %s94_s5 }
  0x14   :  { %100 = dma.hbm_to_vmem [thread:$0]  %s93_s2, 256, %s95_s5, [#allocation14], %s2052_s17, %s2052_s17, %s2053_s18  }
  0x15   :  { %2041 = dma.done.wait [#allocation5], 1024  }
  0x16   :  { %2042 = vsyncadd [#allocation5], 4294966272 }
  0x17   :  { %2043 = dma.done.wait [#allocation8], 384  }
  0x18   :  { %2044 = vsyncadd [#allocation8], 4294966912 }
  0x19   :  { %2045 = dma.done.wait [#allocation11], 512  }
  0x1a   :  { %2046 = vsyncadd [#allocation11], 4294966784 }
  0x1b   :  { %2047 = dma.done.wait [#allocation14], 256  }
  0x1c   :  { %2048 = vsyncadd [#allocation14], 4294967040  ;;  %v1733_v0 = vld [vmem:[#allocation7] sm:$0xff]  ;;  %v1735_v1 = vld [vmem:[#allocation9 + $0x8] sm:$0xff]  ;;  %vm157_vm0 = vcmask 130048   ;;  %v2061_v6 = vmov 0   ;;  %v128_v7 = vlaneseq }
  0x1d   :  { %v133_v2 = vld [vmem:[#allocation4] sm:$0xff]  ;;  %v134_v3 = vld [vmem:[#allocation4 + $0x8] sm:$0xff]  ;;  %177 = vmatpush.bf16.msra.mxu0 %v1733_v0  ;;  %234 = vmatpush.bf16.msra.mxu1 %v1735_v1  ;;  %s2062_s19 = smov 32   ;;  %v1737_v40 = vld [vmem:[#allocation9 + $0x8] sm:$0xff]  ;;  %vm224_vm8 = vcmask 261120   ;;  %s2063_s4 = smov [#allocation15]  }
  0x1e   :  { %v141_v4 = vpack.c.bf16 %v134_v3, %v133_v2  ;;  %v1734_v5 = vld [vmem:[#allocation9] sm:$0xff]  ;;  %v2152_v8 = vld [vmem:[%s2426_s3] ss:$0 sm:$0xff]  ;;  %v129_v9 = vand.u32 127, %v128_v7  ;;  %321 = vmatpush.bf16.msra.mxu2 %v1737_v40  ;;  %s1555_s23 = sshll.u32 %s2063_s4, 4  ;;  %s1557_s25 = sshll.u32 %s2432_s9, 4  ;;  %s1556_s23 = int_to_ptr.vmem [resolvable:$true] %s1555_s23  ;;  %s1558_s25 = int_to_ptr.hbm [resolvable:$true] %s1557_s25 }
  0x1f   :  { %v1736_v41 = vld [vmem:[#allocation9] sm:$0xff] }
  0x20   :  { %1574 = vmatmul.msk.bf16.vlgmr.msra.gmra.mxu0 %vm157_vm0, %v141_v4  ;;  %vm130_vm1 = vcmp.ge.s32.totalorder %v129_v9, 64  ;;  %vm131_vm2 = vcmp.lt.s32.totalorder %v129_v9, 96 }
  0x21   :  { %235 = vmatpush.bf16.msra.mxu1 %v1734_v5  ;;  %vm2155_vm3 = vmand %vm130_vm1, %vm131_vm2 }
  0x22   :  { %322 = vmatpush.bf16.msra.mxu2 %v1736_v41 }
  0x24   :  { %236 = vmatmul.bf16.vlgmr.msra.gmra.mxu1 %v2061_v6 }
  0x9d   :  { %v179_v10 = vpop.f32.mrf.mxu0 }
  0x9e   :  { %v180_v11 = vadd.f32 %v2152_v8, %v179_v10 }
  0xa1   :  { %v237_v12 = vpop.f32.mrf.mxu1 }
  0xa2   :  { %v241_v13 = vadd.f32 %v237_v12, %v180_v11 }
  0xa4   :  { %v242_v15 = vmul.f32 2.0, %v241_v13 }
  0xa5   :  { %v181_v48 = vpop.f32.mrf.mxu0 }
  0xa6   :  { %v243_v16 = vsel %vm2155_vm3, %v242_v15, %v241_v13  ;;  %v182_v49 = vadd.f32 %v2152_v8, %v181_v48 }
  0xa7   :  { %v1586_v17 = vmul.f32 -1.442695, %v243_v16  ;;  %v1739_v16 = vld [vmem:[#allocation9 + $0x8] sm:$0xff] }
  0xa8   :  { %408 = vmatpush.bf16.msra.mxu3 %v1739_v16 }
  0xa9   :  { %1776 = vpow2.f32 %v1586_v17  ;;  %v239_v18 = vpop.f32.mrf.mxu1  ;;  %v135_v17 = vld [vmem:[#allocation4 + $0x10] sm:$0xff] }
  0xaa   :  { %v136_v18 = vld [vmem:[#allocation4 + $0x18] sm:$0xff] }
  0xaf   :  { %v1777_v19 = vpop.eup %1776 }
  0xb0   :  { %v247_v20 = vadd.f32 1.0, %v1777_v19  ;;  %v142_v19 = vpack.c.bf16 %v136_v18, %v135_v17 }
  0xb2   :  { %1778 = vrcp.f32 %v247_v20  ;;  %v259_v24 = vand.u32 2147483648, %v247_v20  ;;  %v257_v26 = vand.u32 2147483647, %v247_v20  ;;  %vm253_vm5 = vweird.f32 %v247_v20  ;;  %1575 = vmatmul.msk.bf16.gmra.mxu0 %vm157_vm0, %v142_v19 }
  0xb4   :  { %v260_v28 = vor.u32 1.1754944e-38, %v259_v24  ;;  %vm258_vm7 = vcmp.eq.f32.partialorder %v257_v26, 8.507059e+37 }
  0xb8   :  { %v1779_v21 = vpop.eup %1778 }
  0xb9   :  { %v249_v22 = vmul.f32 %v1779_v21, %v247_v20  ;;  %vm254_vm4 = vweird.f32 %v1779_v21  ;;  %v1738_v20 = vld [vmem:[#allocation9] sm:$0xff] }
  0xba   :  { %vm255_vm6 = vmor %vm253_vm5, %vm254_vm4  ;;  %409 = vmatpush.bf16.msra.mxu3 %v1738_v20 }
  0xbb   :  { %v250_v23 = vsub.f32 1.0, %v249_v22 }
  0xbd   :  { %v251_v25 = vmul.f32 %v1779_v21, %v250_v23 }
  0xbf   :  { %v252_v27 = vadd.f32 %v1779_v21, %v251_v25 }
  0xc1   :  { %v256_v29 = vsel %vm255_vm6, %v1779_v21, %v252_v27 }
  0xc2   :  { %v261_v30 = vsel %vm258_vm7, %v260_v28, %v256_v29 }
  0xc3   :  { %v263_v31 = vmul.f32 2.0, %v261_v30 }
  0xc5   :  { %v1587_v32 = vadd.f32 -1.0, %v263_v31 }
  0xc7   :  { %v265_v33 = vsel %vm2155_vm3, %v1587_v32, %v261_v30 }
  0xc8   :  { %268 = vrot.lane.b32.xlu0 %v265_v33, %s2052_s17  ;;  %v266_v36 = vmul.f32 0.0, %v265_v33 }
 0x12f   :  { %v184_v27 = vpop.f32.mrf.mxu0 }
 0x130   :  { %v185_v28 = vadd.f32 %v2152_v8, %v184_v27 }
 0x13a   :  { %v269_v34 = vpop.permute.xlu0 %268 }
 0x13b   :  { %v271_v35 = vmul.f32 %v269_v34, %v265_v33 }
 0x13d   :  { %273 = vrot.lane.b32.xlu0 %v271_v35, %s2062_s19 }
 0x1af   :  { %v274_v37 = vpop.permute.xlu0 %273 }
 0x1b0   :  { %v276_v38 = vadd.f32 %v274_v37, %v266_v36 }
 0x1b2   :  { %1780 = vtanh.f32 %v276_v38 }
 0x1b8   :  { %v1781_v39 = vpop.eup %1780 }
 0x1b9   :  { %279 = vrot.lane.b32.xlu1 %v1781_v39, %s2052_s17 }
 0x22b   :  { %v280_v42 = vpop.permute.xlu1 %279 }
 0x22c   :  { %v282_v43 = vmul.f32 %v280_v42, %v265_v33 }
 0x22e   :  { %v2166_v44 = vpack.c.bf16 %v282_v43, %v282_v43 }
 0x230   :  { %v296_v45 = vunpack.c.l.b16 %v2166_v44 }
 0x232   :  { %v297_v46 = vpack.c.b16 %v296_v45, %v296_v45 }
 0x234   :  { %298 = vrot.lane.b32.xlu1 %v297_v46, %s2062_s19 }
 0x2a6   :  { %v299_v47 = vpop.permute.xlu1 %298 }
 0x2a7   :  { %1596 = vmatmul.msk.bf16.vlgmr.msra.gmra.mxu2 %vm224_vm8, %v299_v47 }
 0x32a   :  { %v324_v50 = vpop.f32.mrf.mxu2 }
 0x32b   :  { %v328_v51 = vadd.f32 %v324_v50, %v182_v49 }
 0x32d   :  { %v329_v52 = vmul.f32 2.0, %v328_v51 }
 0x32f   :  { %v330_v53 = vsel %vm2155_vm3, %v329_v52, %v328_v51 }
 0x330   :  { %v1597_v54 = vmul.f32 -1.442695, %v330_v53 }
 0x332   :  { %1782 = vpow2.f32 %v1597_v54  ;;  %v326_v55 = vpop.f32.mrf.mxu2 }
 0x338   :  { %v1783_v56 = vpop.eup %1782 }
 0x339   :  { %v334_v57 = vadd.f32 1.0, %v1783_v56 }
 0x33b   :  { %1784 = vrcp.f32 %v334_v57  ;;  %v346_v61 = vand.u32 2147483648, %v334_v57  ;;  %v344_v63 = vand.u32 2147483647, %v334_v57  ;;  %vm340_vm10 = vweird.f32 %v334_v57 }
 0x33d   :  { %v347_v1 = vor.u32 1.1754944e-38, %v346_v61  ;;  %vm345_vm12 = vcmp.eq.f32.partialorder %v344_v63, 8.507059e+37 }
 0x341   :  { %v1785_v58 = vpop.eup %1784 }
 0x342   :  { %v336_v59 = vmul.f32 %v1785_v58, %v334_v57  ;;  %vm341_vm9 = vweird.f32 %v1785_v58  ;;  %v1741_v57 = vld [vmem:[#allocation9 + $0x8] sm:$0xff] }
 0x343   :  { %vm342_vm11 = vmor %vm340_vm10, %vm341_vm9  ;;  %495 = vmatpush.bf16.msrb.mxu1 %v1741_v57 }
 0x344   :  { %v337_v60 = vsub.f32 1.0, %v336_v59 }
 0x346   :  { %v338_v62 = vmul.f32 %v1785_v58, %v337_v60 }
 0x348   :  { %v339_v0 = vadd.f32 %v1785_v58, %v338_v62 }
 0x34a   :  { %v343_v2 = vsel %vm342_vm11, %v1785_v58, %v339_v0  ;;  %v1740_v58 = vld [vmem:[#allocation9] sm:$0xff] }
 0x34b   :  { %v348_v3 = vsel %vm345_vm12, %v347_v1, %v343_v2  ;;  %496 = vmatpush.bf16.msrb.mxu1 %v1740_v58  ;;  %v186_v1 = vpop.f32.mrf.mxu0 }
 0x34c   :  { %v350_v4 = vmul.f32 2.0, %v348_v3  ;;  %v187_v2 = vadd.f32 %v2152_v8, %v186_v1 }
 0x34e   :  { %v1598_v5 = vadd.f32 -1.0, %v350_v4 }
 0x350   :  { %v352_v7 = vsel %vm2155_vm3, %v1598_v5, %v348_v3 }
 0x351   :  { %355 = vrot.lane.b32.xlu2 %v352_v7, %s2052_s17  ;;  %v353_v11 = vmul.f32 %v352_v7, %v276_v38 }
 0x3ab   :  { %v356_v9 = vpop.permute.xlu2 %355 }
 0x3ac   :  { %v358_v10 = vmul.f32 %v356_v9, %v352_v7 }
 0x3ae   :  { %360 = vrot.lane.b32.xlu2 %v358_v10, %s2062_s19 }
 0x408   :  { %v361_v12 = vpop.permute.xlu2 %360 }
 0x409   :  { %v363_v13 = vadd.f32 %v361_v12, %v353_v11 }
 0x40b   :  { %1786 = vtanh.f32 %v363_v13 }
 0x411   :  { %v1787_v15 = vpop.eup %1786 }
 0x412   :  { %366 = vrot.lane.b32.xlu0 %v1787_v15, %s2052_s17 }
 0x484   :  { %v367_v21 = vpop.permute.xlu0 %366 }
 0x485   :  { %v369_v22 = vmul.f32 %v367_v21, %v352_v7 }
 0x487   :  { %v2180_v23 = vpack.c.bf16 %v369_v22, %v369_v22 }
 0x489   :  { %v383_v24 = vunpack.c.l.b16 %v2180_v23 }
 0x48b   :  { %v384_v25 = vpack.c.b16 %v383_v24, %v383_v24 }
 0x48d   :  { %385 = vrot.lane.b32.xlu1 %v384_v25, %s2062_s19 }
 0x4ff   :  { %v386_v26 = vpop.permute.xlu1 %385 }
 0x500   :  { %1607 = vmatmul.msk.bf16.vlgmr.msra.gmra.mxu3 %vm224_vm8, %v386_v26 }
 0x583   :  { %v411_v29 = vpop.f32.mrf.mxu3 }
 0x584   :  { %v415_v30 = vadd.f32 %v411_v29, %v185_v28 }
 0x586   :  { %v416_v31 = vmul.f32 2.0, %v415_v30 }
 0x588   :  { %v417_v32 = vsel %vm2155_vm3, %v416_v31, %v415_v30 }
 0x589   :  { %v1608_v33 = vmul.f32 -1.442695, %v417_v32 }
 0x58b   :  { %1788 = vpow2.f32 %v1608_v33  ;;  %v413_v34 = vpop.f32.mrf.mxu3 }
 0x58c   :  { %v1743_v34 = vld [vmem:[#allocation9 + $0x8] sm:$0xff] }
 0x58d   :  { %582 = vmatpush.bf16.msrb.mxu2 %v1743_v34 }
 0x591   :  { %v1789_v35 = vpop.eup %1788 }
 0x592   :  { %v421_v36 = vadd.f32 1.0, %v1789_v35  ;;  %v137_v35 = vld [vmem:[#allocation4 + $0x20] sm:$0xff] }
 0x594   :  { %1790 = vrcp.f32 %v421_v36  ;;  %v433_v40 = vand.u32 2147483648, %v421_v36  ;;  %v431_v42 = vand.u32 2147483647, %v421_v36  ;;  %vm427_vm14 = vweird.f32 %v421_v36 }
 0x596   :  { %v434_v45 = vor.u32 1.1754944e-38, %v433_v40  ;;  %vm432_vm1 = vcmp.eq.f32.partialorder %v431_v42, 8.507059e+37 }
 0x59a   :  { %v1791_v37 = vpop.eup %1790 }
 0x59b   :  { %v423_v38 = vmul.f32 %v1791_v37, %v421_v36  ;;  %vm428_vm13 = vweird.f32 %v1791_v37  ;;  %v138_v36 = vld [vmem:[#allocation4 + $0x28] sm:$0xff] }
 0x59c   :  { %vm429_vm15 = vmor %vm427_vm14, %vm428_vm13 }
 0x59d   :  { %v424_v39 = vsub.f32 1.0, %v423_v38  ;;  %v143_v38 = vpack.c.bf16 %v138_v36, %v137_v35 }
 0x59f   :  { %v425_v41 = vmul.f32 %v1791_v37, %v424_v39  ;;  %1576 = vmatmul.msk.bf16.gmra.mxu0 %vm157_vm0, %v143_v38 }
 0x5a1   :  { %v426_v43 = vadd.f32 %v1791_v37, %v425_v41 }
 0x5a3   :  { %v430_v46 = vsel %vm429_vm15, %v1791_v37, %v426_v43  ;;  %v1742_v37 = vld [vmem:[#allocation9] sm:$0xff] }
 0x5a4   :  { %v435_v47 = vsel %vm432_vm1, %v434_v45, %v430_v46  ;;  %583 = vmatpush.bf16.msrb.mxu2 %v1742_v37  ;;  %vm288_vm1 = vcmask 257024  }
 0x5a5   :  { %v437_v48 = vmul.f32 2.0, %v435_v47 }
 0x5a7   :  { %v1609_v49 = vadd.f32 -1.0, %v437_v48 }
 0x5a9   :  { %v439_v50 = vsel %vm2155_vm3, %v1609_v49, %v435_v47 }
 0x5aa   :  { %442 = vrot.lane.b32.xlu2 %v439_v50, %s2052_s17  ;;  %v440_v53 = vmul.f32 %v439_v50, %v363_v13 }
 0x604   :  { %v443_v51 = vpop.permute.xlu2 %442 }
 0x605   :  { %v445_v52 = vmul.f32 %v443_v51, %v439_v50 }
 0x607   :  { %447 = vrot.lane.b32.xlu0 %v445_v52, %s2062_s19 }
 0x61c   :  { %v189_v46 = vpop.f32.mrf.mxu0 }
 0x61d   :  { %v190_v47 = vadd.f32 %v2152_v8, %v189_v46 }
 0x679   :  { %v448_v54 = vpop.permute.xlu0 %447 }
 0x67a   :  { %v450_v55 = vadd.f32 %v448_v54, %v440_v53 }
 0x67c   :  { %1792 = vtanh.f32 %v450_v55 }
 0x682   :  { %v1793_v56 = vpop.eup %1792 }
 0x683   :  { %453 = vrot.lane.b32.xlu1 %v1793_v56, %s2052_s17 }
 0x6f5   :  { %v454_v59 = vpop.permute.xlu1 %453 }
 0x6f6   :  { %v456_v60 = vmul.f32 %v454_v59, %v439_v50 }
 0x6f8   :  { %v2193_v61 = vpack.c.bf16 %v456_v60, %v456_v60 }
 0x6fa   :  { %v470_v62 = vunpack.c.l.b16 %v2193_v61 }
 0x6fc   :  { %v471_v63 = vpack.c.b16 %v470_v62, %v470_v62 }
 0x6fe   :  { %472 = vrot.lane.b32.xlu2 %v471_v63, %s2062_s19 }
 0x758   :  { %v473_v0 = vpop.permute.xlu2 %472 }
 0x759   :  { %1618 = vmatmul.msk.bf16.vlgmr.msrb.gmra.mxu1 %vm224_vm8, %v473_v0 }
 0x7d6   :  { %v498_v3 = vpop.f32.mrf.mxu1 }
 0x7d7   :  { %v502_v4 = vadd.f32 %v498_v3, %v187_v2 }
 0x7d9   :  { %v503_v5 = vmul.f32 2.0, %v502_v4 }
 0x7db   :  { %v504_v7 = vsel %vm2155_vm3, %v503_v5, %v502_v4 }
 0x7dc   :  { %v1619_v9 = vmul.f32 -1.442695, %v504_v7 }
 0x7de   :  { %1794 = vpow2.f32 %v1619_v9  ;;  %v500_v10 = vpop.f32.mrf.mxu1 }
 0x7e4   :  { %v1795_v11 = vpop.eup %1794 }
 0x7e5   :  { %v508_v12 = vadd.f32 1.0, %v1795_v11 }
 0x7e7   :  { %1796 = vrcp.f32 %v508_v12  ;;  %v520_v17 = vand.u32 2147483648, %v508_v12  ;;  %v518_v19 = vand.u32 2147483647, %v508_v12  ;;  %vm514_vm4 = vweird.f32 %v508_v12 }
 0x7e9   :  { %v521_v21 = vor.u32 1.1754944e-38, %v520_v17  ;;  %vm519_vm6 = vcmp.eq.f32.partialorder %v518_v19, 8.507059e+37 }
 0x7ed   :  { %v1797_v13 = vpop.eup %1796 }
 0x7ee   :  { %v510_v15 = vmul.f32 %v1797_v13, %v508_v12  ;;  %vm515_vm2 = vweird.f32 %v1797_v13 }
 0x7ef   :  { %vm516_vm5 = vmor %vm514_vm4, %vm515_vm2 }
 0x7f0   :  { %v511_v16 = vsub.f32 1.0, %v510_v15  ;;  %v1745_v15 = vld [vmem:[#allocation9 + $0x8] sm:$0xff] }
 0x7f1   :  { %669 = vmatpush.bf16.msrb.mxu3 %v1745_v15 }
 0x7f2   :  { %v512_v18 = vmul.f32 %v1797_v13, %v511_v16  ;;  %v1744_v16 = vld [vmem:[#allocation9] sm:$0xff] }
 0x7f4   :  { %v513_v20 = vadd.f32 %v1797_v13, %v512_v18 }
 0x7f5   :  { %670 = vmatpush.bf16.msrb.mxu3 %v1744_v16 }
 0x7f6   :  { %v517_v22 = vsel %vm516_vm5, %v1797_v13, %v513_v20 }
 0x7f7   :  { %v522_v24 = vsel %vm519_vm6, %v521_v21, %v517_v22 }
 0x7f8   :  { %v524_v25 = vmul.f32 2.0, %v522_v24 }
 0x7fa   :  { %v1620_v26 = vadd.f32 -1.0, %v524_v25 }
 0x7fc   :  { %v526_v27 = vsel %vm2155_vm3, %v1620_v26, %v522_v24  ;;  %v191_v24 = vpop.f32.mrf.mxu0 }
 0x7fd   :  { %529 = vrot.lane.b32.xlu0 %v526_v27, %s2052_s17  ;;  %v527_v30 = vmul.f32 %v526_v27, %v450_v55  ;;  %v192_v25 = vadd.f32 %v2152_v8, %v191_v24 }
 0x86f   :  { %v530_v28 = vpop.permute.xlu0 %529 }
 0x870   :  { %v532_v29 = vmul.f32 %v530_v28, %v526_v27 }
 0x872   :  { %534 = vrot.lane.b32.xlu1 %v532_v29, %s2062_s19 }
 0x8e4   :  { %v535_v31 = vpop.permute.xlu1 %534 }
 0x8e5   :  { %v537_v32 = vadd.f32 %v535_v31, %v527_v30 }
 0x8e7   :  { %1798 = vtanh.f32 %v537_v32 }
 0x8ed   :  { %v1799_v33 = vpop.eup %1798 }
 0x8ee   :  { %540 = vrot.lane.b32.xlu2 %v1799_v33, %s2052_s17 }
 0x948   :  { %v541_v39 = vpop.permute.xlu2 %540 }
 0x949   :  { %v543_v40 = vmul.f32 %v541_v39, %v526_v27 }
 0x94b   :  { %v2207_v41 = vpack.c.bf16 %v543_v40, %v543_v40 }
 0x94d   :  { %v557_v42 = vunpack.c.l.b16 %v2207_v41 }
 0x94f   :  { %v558_v43 = vpack.c.b16 %v557_v42, %v557_v42 }
 0x951   :  { %559 = vrot.lane.b32.xlu0 %v558_v43, %s2062_s19 }
 0x9c3   :  { %v560_v45 = vpop.permute.xlu0 %559 }
 0x9c4   :  { %1629 = vmatmul.msk.bf16.vlgmr.msrb.gmra.mxu2 %vm224_vm8, %v560_v45 }
 0xa47   :  { %v585_v48 = vpop.f32.mrf.mxu2 }
 0xa48   :  { %v589_v49 = vadd.f32 %v585_v48, %v190_v47 }
 0xa4a   :  { %v590_v50 = vmul.f32 2.0, %v589_v49 }
 0xa4c   :  { %v591_v51 = vsel %vm2155_vm3, %v590_v50, %v589_v49 }
 0xa4d   :  { %v1630_v52 = vmul.f32 -1.442695, %v591_v51 }
 0xa4f   :  { %1800 = vpow2.f32 %v1630_v52  ;;  %v587_v53 = vpop.f32.mrf.mxu2 }
 0xa55   :  { %v1801_v54 = vpop.eup %1800 }
 0xa56   :  { %v595_v55 = vadd.f32 1.0, %v1801_v54 }
 0xa58   :  { %1802 = vrcp.f32 %v595_v55  ;;  %v607_v59 = vand.u32 2147483648, %v595_v55  ;;  %v605_v62 = vand.u32 2147483647, %v595_v55  ;;  %vm601_vm9 = vweird.f32 %v595_v55 }
 0xa5a   :  { %v608_v0 = vor.u32 1.1754944e-38, %v607_v59  ;;  %vm606_vm11 = vcmp.eq.f32.partialorder %v605_v62, 8.507059e+37  ;;  %v140_v59 = vld [vmem:[#allocation4 + $0x38] sm:$0xff] }
 0xa5e   :  { %v1803_v56 = vpop.eup %1802 }
 0xa5f   :  { %v597_v57 = vmul.f32 %v1803_v56, %v595_v55  ;;  %vm602_vm7 = vweird.f32 %v1803_v56 }
 0xa60   :  { %vm603_vm10 = vmor %vm601_vm9, %vm602_vm7 }
 0xa61   :  { %v598_v58 = vsub.f32 1.0, %v597_v57  ;;  %v1754_v57 = vld [vmem:[#allocation10] sm:$0xff] }
 0xa63   :  { %v599_v60 = vmul.f32 %v1803_v56, %v598_v58  ;;  %v139_v58 = vld [vmem:[#allocation4 + $0x30] sm:$0xff] }
 0xa64   :  { %v144_v62 = vpack.c.bf16 %v140_v59, %v139_v58 }
 0xa65   :  { %v600_v63 = vadd.f32 %v1803_v56, %v599_v60  ;;  %v1746_v60 = vld [vmem:[#allocation9] sm:$0xff] }
 0xa66   :  { %1577 = vmatmul.msk.bf16.gmra.mxu0 %vm157_vm0, %v144_v62 }
 0xa67   :  { %v604_v1 = vsel %vm603_vm10, %v1803_v56, %v600_v63  ;;  %v1755_v56 = vld [vmem:[#allocation10 + $0x8] sm:$0xff] }
 0xa68   :  { %v609_v2 = vsel %vm606_vm11, %v608_v0, %v604_v1  ;;  %965 = vmatpush.bf16.msra.mxu3 %v1755_v56 }
 0xa69   :  { %v611_v3 = vmul.f32 2.0, %v609_v2 }
 0xa6b   :  { %v1631_v4 = vadd.f32 -1.0, %v611_v3 }
 0xa6c   :  { %966 = vmatpush.bf16.msra.mxu3 %v1754_v57 }
 0xa6d   :  { %v613_v5 = vsel %vm2155_vm3, %v1631_v4, %v609_v2 }
 0xa6e   :  { %616 = vrot.lane.b32.xlu1 %v613_v5, %s2052_s17  ;;  %v614_v10 = vmul.f32 %v613_v5, %v537_v32 }
 0xae0   :  { %v617_v7 = vpop.permute.xlu1 %616 }
 0xae1   :  { %v619_v9 = vmul.f32 %v617_v7, %v613_v5  ;;  %v2251_v7 = vld [vmem:[#allocation12] sm:$0xff] }
 0xae3   :  { %621 = vrot.lane.b32.xlu2 %v619_v9, %s2062_s19 }
 0xb3d   :  { %v622_v11 = vpop.permute.xlu2 %621 }
 0xb3e   :  { %v624_v12 = vadd.f32 %v622_v11, %v614_v10  ;;  %v194_v10 = vpop.f32.mrf.mxu0 }
 0xb3f   :  { %v195_v11 = vadd.f32 %v2152_v8, %v194_v10 }
 0xb40   :  { %1804 = vtanh.f32 %v624_v12 }
 0xb46   :  { %v1805_v13 = vpop.eup %1804 }
 0xb47   :  { %627 = vrot.lane.b32.xlu0 %v1805_v13, %s2052_s17 }
 0xbb9   :  { %v628_v17 = vpop.permute.xlu0 %627 }
 0xbba   :  { %v630_v18 = vmul.f32 %v628_v17, %v613_v5  ;;  %v2248_v5 = vld [vmem:[#allocation12 + $0x8] sm:$0xff] }
 0xbbb   :  { %1145 = vmatpush.bf16.msrb.mxu0 %v2248_v5 }
 0xbbc   :  { %v2220_v19 = vpack.c.bf16 %v630_v18, %v630_v18 }
 0xbbe   :  { %v644_v20 = vunpack.c.l.b16 %v2220_v19 }
 0xbbf   :  { %1146 = vmatpush.bf16.msrb.mxu0 %v2251_v7 }
 0xbc0   :  { %v645_v21 = vpack.c.b16 %v644_v20, %v644_v20 }
 0xbc2   :  { %646 = vrot.lane.b32.xlu1 %v645_v21, %s2062_s19 }
 0xbc3   :  { %1334 = vmatpush.bf16.msra.mxu0 %v2248_v5 }
 0xbc7   :  { %1335 = vmatpush.bf16.msra.mxu0 %v2251_v7 }
 0xc34   :  { %v647_v22 = vpop.permute.xlu1 %646 }
 0xc35   :  { %1640 = vmatmul.msk.bf16.vlgmr.msrb.gmra.mxu3 %vm224_vm8, %v647_v22 }
 0xcb8   :  { %v672_v26 = vpop.f32.mrf.mxu3 }
 0xcb9   :  { %v676_v27 = vadd.f32 %v672_v26, %v192_v25 }
 0xcbb   :  { %v677_v28 = vmul.f32 2.0, %v676_v27 }
 0xcbd   :  { %v678_v29 = vsel %vm2155_vm3, %v677_v28, %v676_v27 }
 0xcbe   :  { %v1641_v30 = vmul.f32 -1.442695, %v678_v29 }
 0xcc0   :  { %1806 = vpow2.f32 %v1641_v30  ;;  %v674_v31 = vpop.f32.mrf.mxu3 }
 0xcc6   :  { %v1807_v32 = vpop.eup %1806 }
 0xcc7   :  { %v682_v33 = vadd.f32 1.0, %v1807_v32 }
 0xcc9   :  { %1808 = vrcp.f32 %v682_v33  ;;  %v694_v37 = vand.u32 2147483648, %v682_v33  ;;  %v692_v39 = vand.u32 2147483647, %v682_v33  ;;  %vm688_vm13 = vweird.f32 %v682_v33 }
 0xccb   :  { %v695_v42 = vor.u32 1.1754944e-38, %v694_v37  ;;  %vm693_vm15 = vcmp.eq.f32.partialorder %v692_v39, 8.507059e+37 }
 0xccf   :  { %v1809_v34 = vpop.eup %1808 }
 0xcd0   :  { %v684_v35 = vmul.f32 %v1809_v34, %v682_v33  ;;  %vm689_vm12 = vweird.f32 %v1809_v34 }
 0xcd1   :  { %vm690_vm14 = vmor %vm688_vm13, %vm689_vm12 }
 0xcd2   :  { %v685_v36 = vsub.f32 1.0, %v684_v35 }
 0xcd4   :  { %v686_v38 = vmul.f32 %v1809_v34, %v685_v36 }
 0xcd6   :  { %v687_v40 = vadd.f32 %v1809_v34, %v686_v38 }
 0xcd8   :  { %v691_v43 = vsel %vm690_vm14, %v1809_v34, %v687_v40 }
 0xcd9   :  { %v696_v45 = vsel %vm693_vm15, %v695_v42, %v691_v43 }
 0xcda   :  { %v698_v46 = vmul.f32 2.0, %v696_v45 }
 0xcdc   :  { %v1642_v47 = vadd.f32 -1.0, %v698_v46 }
 0xcde   :  { %v700_v48 = vsel %vm2155_vm3, %v1642_v47, %v696_v45 }
 0xcdf   :  { %703 = vrot.lane.b32.xlu2 %v700_v48, %s2052_s17  ;;  %v701_v51 = vmul.f32 %v700_v48, %v624_v12 }
 0xd39   :  { %v704_v49 = vpop.permute.xlu2 %703 }
 0xd3a   :  { %v706_v50 = vmul.f32 %v704_v49, %v700_v48 }
 0xd3c   :  { %708 = vrot.lane.b32.xlu0 %v706_v50, %s2062_s19 }
 0xd44   :  { %285 = vrot.lane.b32.xlu0 %v2166_v44, %s2062_s19  ;;  %v1747_v44 = vld [vmem:[#allocation9 + $0x8] sm:$0xff] }
 0xd45   :  { %756 = vmatpush.bf16.msra.mxu1 %v1747_v44 }
 0xd49   :  { %757 = vmatpush.bf16.msra.mxu1 %v1746_v60 }
 0xd4d   :  { %1019 = vmatpush.bf16.msrb.mxu1 %v2248_v5 }
 0xd51   :  { %1020 = vmatpush.bf16.msrb.mxu1 %v2251_v7 }
 0xdae   :  { %v709_v52 = vpop.permute.xlu0 %708 }
 0xdaf   :  { %v2234_v53 = vadd.f32 %v709_v52, %v701_v51 }
 0xdb1   :  { %1810 = vtanh.f32 %v2234_v53 }
 0xdb6   :  { %v286_v54 = vpop.permute.xlu0 %285 }
 0xdb7   :  { %v1811_v55 = vpop.eup %1810  ;;  %289 = vst.msk [vmem:[#allocation3] sm:$0xf] %vm288_vm1, %v286_v54 }
 0xdb8   :  { %714 = vrot.lane.b32.xlu1 %v1811_v55, %s2052_s17 }
 0xdc0   :  { %372 = vrot.lane.b32.xlu1 %v2180_v23, %s2062_s19 }
 0xe2a   :  { %v715_v63 = vpop.permute.xlu1 %714 }
 0xe2b   :  { %v717_v0 = vmul.f32 %v715_v63, %v700_v48 }
 0xe2d   :  { %v2242_v1 = vpack.c.bf16 %v717_v0, %v717_v0 }
 0xe2f   :  { %v731_v2 = vunpack.c.l.b16 %v2242_v1 }
 0xe31   :  { %v732_v23 = vpack.c.b16 %v731_v2, %v731_v2 }
 0xe32   :  { %v373_v3 = vpop.permute.xlu1 %372 }
 0xe33   :  { %376 = vst.msk [vmem:[#allocation3 + $0x4] sm:$0xf] %vm288_vm1, %v373_v3  ;;  %733 = vrot.lane.b32.xlu2 %v732_v23, %s2062_s19 }
 0xe3a   :  { %v1750_v4 = vld [vmem:[#allocation3] sm:$0xff] }
 0xe3b   :  { %1689 = vmatmul.msk.bf16.vlgmr.msra.gmra.mxu3 %vm224_vm8, %v1750_v4 }
 0xe8d   :  { %v734_v9 = vpop.permute.xlu2 %733 }
 0xe8e   :  { %1651 = vmatmul.msk.bf16.vlgmr.msra.gmra.mxu1 %vm224_vm8, %v734_v9 }
 0xe8f   :  { %1208 = vmatpush.bf16.msra.mxu1 %v2248_v5 }
 0xe93   :  { %1209 = vmatpush.bf16.msra.mxu1 %v2251_v7 }
 0xe9e   :  { %1021 = vmatmul.bf16.vlgmr.msrb.gmra.mxu1 %v2061_v6  ;;  %v2270_v6 = vld [vmem:[%s2429_s6] ss:$0 sm:$0xff] }
 0xe9f   :  { %1397 = vmatpush.bf16.msrb.mxu1 %v2248_v5 }
 0xea3   :  { %1398 = vmatpush.bf16.msrb.mxu1 %v2251_v7 }
 0xebe   :  { %v968_v20 = vpop.f32.mrf.mxu3 }
 0xebf   :  { %v969_v22 = vadd.f32 %v2270_v6, %v968_v20 }
 0xf0b   :  { %v759_v12 = vpop.f32.mrf.mxu1 }
 0xf0c   :  { %v763_v13 = vadd.f32 %v759_v12, %v195_v11 }
 0xf0e   :  { %v764_v15 = vmul.f32 2.0, %v763_v13 }
 0xf10   :  { %v765_v16 = vsel %vm2155_vm3, %v764_v15, %v763_v13  ;;  %v1749_v13 = vld [vmem:[#allocation9 + $0x8] sm:$0xff] }
 0xf11   :  { %v1652_v17 = vmul.f32 -1.442695, %v765_v16  ;;  %843 = vmatpush.bf16.msra.mxu2 %v1749_v13 }
 0xf13   :  { %1812 = vpow2.f32 %v1652_v17  ;;  %v761_v18 = vpop.f32.mrf.mxu1 }
 0xf19   :  { %v1813_v21 = vpop.eup %1812 }
 0xf1a   :  { %v769_v24 = vadd.f32 1.0, %v1813_v21 }
 0xf1b   :  { %v1022_v8 = vpop.f32.mrf.mxu1 }
 0xf1c   :  { %1814 = vrcp.f32 %v769_v24  ;;  %v1026_v25 = vadd.f32 %v1022_v8, %v969_v22  ;;  %v781_v33 = vand.u32 2147483648, %v769_v24  ;;  %v779_v35 = vand.u32 2147483647, %v769_v24 }
 0xf1d   :  { %vm775_vm2 = vweird.f32 %v769_v24 }
 0xf1e   :  { %v1027_v26 = vmul.f32 2.0, %v1026_v25  ;;  %v782_v39 = vor.u32 1.1754944e-38, %v781_v33  ;;  %vm780_vm5 = vcmp.eq.f32.partialorder %v779_v35, 8.507059e+37 }
 0xf20   :  { %v1028_v27 = vsel %vm2155_vm3, %v1027_v26, %v1026_v25 }
 0xf21   :  { %v1701_v28 = vmul.f32 -1.442695, %v1028_v27 }
 0xf22   :  { %v1815_v29 = vpop.eup %1814 }
 0xf23   :  { %1816 = vpow2.f32 %v1701_v28  ;;  %v1024_v30 = vpop.f32.mrf.mxu1  ;;  %v771_v31 = vmul.f32 %v1815_v29, %v769_v24  ;;  %vm776_vm0 = vweird.f32 %v1815_v29  ;;  %v970_v28 = vpop.f32.mrf.mxu3 }
 0xf24   :  { %vm777_vm4 = vmor %vm775_vm2, %vm776_vm0 }
 0xf25   :  { %v772_v32 = vsub.f32 1.0, %v771_v31 }
 0xf27   :  { %v773_v34 = vmul.f32 %v1815_v29, %v772_v32 }
 0xf29   :  { %v1817_v36 = vpop.eup %1816  ;;  %v774_v37 = vadd.f32 %v1815_v29, %v773_v34 }
 0xf2a   :  { %v1032_v38 = vadd.f32 1.0, %v1817_v36 }
 0xf2b   :  { %v778_v40 = vsel %vm777_vm4, %v1815_v29, %v774_v37  ;;  %v971_v29 = vadd.f32 %v2270_v6, %v970_v28 }
 0xf2c   :  { %1818 = vrcp.f32 %v1032_v38  ;;  %v783_v42 = vsel %vm780_vm5, %v782_v39, %v778_v40  ;;  %v1044_v50 = vand.u32 2147483648, %v1032_v38  ;;  %v1042_v52 = vand.u32 2147483647, %v1032_v38 }
 0xf2d   :  { %v785_v43 = vmul.f32 2.0, %v783_v42  ;;  %vm1038_vm7 = vweird.f32 %v1032_v38 }
 0xf2e   :  { %v1045_v55 = vor.u32 1.1754944e-38, %v1044_v50  ;;  %vm1043_vm10 = vcmp.eq.f32.partialorder %v1042_v52, 8.507059e+37 }
 0xf2f   :  { %v1653_v45 = vadd.f32 -1.0, %v785_v43 }
 0xf31   :  { %v787_v46 = vsel %vm2155_vm3, %v1653_v45, %v783_v42 }
 0xf32   :  { %v1819_v47 = vpop.eup %1818  ;;  %790 = vrot.lane.b32.xlu2 %v787_v46, %s2052_s17  ;;  %v788_v2 = vmul.f32 %v787_v46, %v2234_v53  ;;  %v1748_v53 = vld [vmem:[#allocation9] sm:$0xff] }
 0xf33   :  { %v1034_v48 = vmul.f32 %v1819_v47, %v1032_v38  ;;  %vm1039_vm6 = vweird.f32 %v1819_v47  ;;  %844 = vmatpush.bf16.msra.mxu2 %v1748_v53 }
 0xf34   :  { %vm1040_vm9 = vmor %vm1038_vm7, %vm1039_vm6 }
 0xf35   :  { %v1035_v49 = vsub.f32 1.0, %v1034_v48 }
 0xf37   :  { %v1036_v51 = vmul.f32 %v1819_v47, %v1035_v49  ;;  %1082 = vmatpush.bf16.msrb.mxu2 %v2248_v5 }
 0xf39   :  { %v1037_v54 = vadd.f32 %v1819_v47, %v1036_v51 }
 0xf3b   :  { %v1041_v56 = vsel %vm1040_vm9, %v1819_v47, %v1037_v54  ;;  %1083 = vmatpush.bf16.msrb.mxu2 %v2251_v7 }
 0xf3c   :  { %v1046_v57 = vsel %vm1043_vm10, %v1045_v55, %v1041_v56 }
 0xf3d   :  { %v1048_v44 = vmul.f32 2.0, %v1046_v57 }
 0xf3f   :  { %v1702_v58 = vadd.f32 -1.0, %v1048_v44 }
 0xf41   :  { %v1050_v59 = vsel %vm2155_vm3, %v1702_v58, %v1046_v57 }
 0xf42   :  { %1053 = vrot.lane.b32.xlu0 %v1050_v59, %s2052_s17  ;;  %v1051_v9 = vmul.f32 0.0, %v1050_v59 }
 0xf8c   :  { %v791_v60 = vpop.permute.xlu2 %790 }
 0xf8d   :  { %v793_v62 = vmul.f32 %v791_v60, %v787_v46 }
 0xf8f   :  { %795 = vrot.lane.b32.xlu1 %v793_v62, %s2062_s19 }
 0xfb4   :  { %v1054_v63 = vpop.permute.xlu0 %1053 }
 0xfb5   :  { %v1056_v0 = vmul.f32 %v1054_v63, %v1050_v59  ;;  %v2325_v63 = vpop.f32.mrf.mxu0 }
 0xfb7   :  { %1058 = vrot.lane.b32.xlu2 %v1056_v0, %s2062_s19 }
0x1001   :  { %v796_v23 = vpop.permute.xlu1 %795 }
0x1002   :  { %v2284_v3 = vadd.f32 %v796_v23, %v788_v2 }
0x1004   :  { %1820 = vtanh.f32 %v2284_v3 }
0x100a   :  { %v1821_v4 = vpop.eup %1820 }
0x100b   :  { %801 = vrot.lane.b32.xlu0 %v1821_v4, %s2052_s17 }
0x1011   :  { %v1059_v10 = vpop.permute.xlu2 %1058 }
0x1012   :  { %v2288_v11 = vadd.f32 %v1059_v10, %v1051_v9 }
0x1014   :  { %1822 = vtanh.f32 %v2288_v11 }
0x101a   :  { %v1823_v12 = vpop.eup %1822 }
0x101b   :  { %1064 = vrot.lane.b32.xlu1 %v1823_v12, %s2052_s17 }
0x107d   :  { %v802_v15 = vpop.permute.xlu0 %801 }
0x107e   :  { %v804_v16 = vmul.f32 %v802_v15, %v787_v46 }
0x1080   :  { %v2294_v17 = vpack.c.bf16 %v804_v16, %v804_v16 }
0x1082   :  { %v818_v18 = vunpack.c.l.b16 %v2294_v17 }
0x1084   :  { %v819_v20 = vpack.c.b16 %v818_v18, %v818_v18 }
0x1086   :  { %820 = vrot.lane.b32.xlu2 %v819_v20, %s2062_s19 }
0x108d   :  { %v1065_v21 = vpop.permute.xlu1 %1064 }
0x108e   :  { %v1067_v22 = vmul.f32 %v1065_v21, %v1050_v59 }
0x1090   :  { %v1068_v24 = vpack.c.bf16 %v1067_v22, %v1067_v22 }
0x1092   :  { %1071 = vrot.lane.b32.xlu0 %v1068_v24, %s2062_s19 }
0x10e0   :  { %v821_v8 = vpop.permute.xlu2 %820 }
0x10e1   :  { %1662 = vmatmul.msk.bf16.vlgmr.msra.gmra.mxu2 %vm224_vm8, %v821_v8 }
0x10e2   :  { %1271 = vmatpush.bf16.msra.mxu2 %v2248_v5 }
0x10e6   :  { %1272 = vmatpush.bf16.msra.mxu2 %v2251_v7 }
0x1104   :  { %v1072_v25 = vpop.permute.xlu0 %1071 }
0x1105   :  { %1703 = vmatmul.msk.bf16.vlgmr.msrb.gmra.mxu2 %vm224_vm8, %v1072_v25 }
0x1106   :  { %1460 = vmatpush.bf16.msrb.mxu2 %v2248_v5 }
0x110a   :  { %1461 = vmatpush.bf16.msrb.mxu2 %v2251_v7 }
0x1164   :  { %v2305_v26 = vpop.f32.mrf.mxu2 }
0x116c   :  { %v848_v27 = vpop.f32.mrf.mxu2 }
0x1188   :  { %v1085_v30 = vpop.f32.mrf.mxu2 }
0x1189   :  { %v1089_v31 = vadd.f32 %v1085_v30, %v971_v29 }
0x118b   :  { %v1090_v32 = vmul.f32 2.0, %v1089_v31 }
0x118d   :  { %v1091_v33 = vsel %vm2155_vm3, %v1090_v32, %v1089_v31 }
0x118e   :  { %v1704_v34 = vmul.f32 -1.442695, %v1091_v33 }
0x1190   :  { %1824 = vpow2.f32 %v1704_v34  ;;  %v1087_v35 = vpop.f32.mrf.mxu2 }
0x1196   :  { %v1825_v36 = vpop.eup %1824 }
0x1197   :  { %v1095_v37 = vadd.f32 1.0, %v1825_v36 }
0x1199   :  { %1826 = vrcp.f32 %v1095_v37  ;;  %v1107_v39 = vand.u32 2147483648, %v1095_v37  ;;  %v1105_v42 = vand.u32 2147483647, %v1095_v37  ;;  %vm1101_vm12 = vweird.f32 %v1095_v37 }
0x119b   :  { %v1108_v45 = vor.u32 1.1754944e-38, %v1107_v39  ;;  %vm1106_vm14 = vcmp.eq.f32.partialorder %v1105_v42, 8.507059e+37 }
0x119f   :  { %v1827_v5 = vpop.eup %1826 }
0x11a0   :  { %v1097_v7 = vmul.f32 %v1827_v5, %v1095_v37  ;;  %vm1102_vm11 = vweird.f32 %v1827_v5 }
0x11a1   :  { %vm1103_vm13 = vmor %vm1101_vm12, %vm1102_vm11 }
0x11a2   :  { %v1098_v38 = vsub.f32 1.0, %v1097_v7 }
0x11a4   :  { %v1099_v40 = vmul.f32 %v1827_v5, %v1098_v38 }
0x11a6   :  { %v1100_v43 = vadd.f32 %v1827_v5, %v1099_v40 }
0x11a8   :  { %v1104_v46 = vsel %vm1103_vm13, %v1827_v5, %v1100_v43 }
0x11a9   :  { %v1109_v47 = vsel %vm1106_vm14, %v1108_v45, %v1104_v46 }
0x11aa   :  { %v1111_v48 = vmul.f32 2.0, %v1109_v47 }
0x11ac   :  { %v1705_v49 = vadd.f32 -1.0, %v1111_v48 }
0x11ae   :  { %v1113_v50 = vsel %vm2155_vm3, %v1705_v49, %v1109_v47 }
0x11af   :  { %1116 = vrot.lane.b32.xlu1 %v1113_v50, %s2052_s17  ;;  %v1114_v55 = vmul.f32 %v1113_v50, %v2288_v11 }
0x11b7   :  { %459 = vrot.lane.b32.xlu1 %v2193_v61, %s2062_s19 }
0x1221   :  { %v1117_v51 = vpop.permute.xlu1 %1116 }
0x1222   :  { %v1119_v52 = vmul.f32 %v1117_v51, %v1113_v50 }
0x1224   :  { %1121 = vrot.lane.b32.xlu2 %v1119_v52, %s2062_s19 }
0x1229   :  { %v460_v54 = vpop.permute.xlu1 %459 }
0x122a   :  { %463 = vst.msk [vmem:[#allocation3 + $0x8] sm:$0xf] %vm288_vm1, %v460_v54 }
0x122c   :  { %546 = vrot.lane.b32.xlu2 %v2207_v41, %s2062_s19 }
0x127e   :  { %v1122_v56 = vpop.permute.xlu2 %1121 }
0x127f   :  { %v1124_v57 = vadd.f32 %v1122_v56, %v1114_v55 }
0x1281   :  { %1828 = vtanh.f32 %v1124_v57 }
0x1286   :  { %v547_v44 = vpop.permute.xlu2 %546 }
0x1287   :  { %v1829_v58 = vpop.eup %1828  ;;  %550 = vst.msk [vmem:[#allocation3 + $0xc] sm:$0xf] %vm288_vm1, %v547_v44 }
0x1288   :  { %1127 = vrot.lane.b32.xlu0 %v1829_v58, %s2052_s17 }
0x128e   :  { %v1751_v61 = vld [vmem:[#allocation3 + $0x8] sm:$0xff] }
0x128f   :  { %1690 = vmatmul.msk.bf16.gmra.mxu3 %vm224_vm8, %v1751_v61 }
0x12fa   :  { %v1128_v59 = vpop.permute.xlu0 %1127 }
0x12fb   :  { %v1130_v60 = vmul.f32 %v1128_v59, %v1113_v50 }
0x12fd   :  { %v1131_v62 = vpack.c.bf16 %v1130_v60, %v1130_v60 }
0x12ff   :  { %1134 = vrot.lane.b32.xlu0 %v1131_v62, %s2062_s19 }
0x1312   :  { %v973_v0 = vpop.f32.mrf.mxu3 }
0x1313   :  { %v974_v2 = vadd.f32 %v2270_v6, %v973_v0 }
0x131a   :  { %v975_v39 = vpop.f32.mrf.mxu3 }
0x131b   :  { %v976_v40 = vadd.f32 %v2270_v6, %v975_v39 }
0x1371   :  { %v1135_v41 = vpop.permute.xlu0 %1134 }
0x1372   :  { %1706 = vmatmul.msk.bf16.vlgmr.msrb.gmra.mxu0 %vm224_vm8, %v1135_v41 }
0x13ef   :  { %v1148_v23 = vpop.f32.mrf.mxu0 }
0x13f0   :  { %v1152_v4 = vadd.f32 %v1148_v23, %v974_v2 }
0x13f2   :  { %v1153_v9 = vmul.f32 2.0, %v1152_v4 }
0x13f4   :  { %v1154_v10 = vsel %vm2155_vm3, %v1153_v9, %v1152_v4 }
0x13f5   :  { %v1707_v11 = vmul.f32 -1.442695, %v1154_v10 }
0x13f7   :  { %1830 = vpow2.f32 %v1707_v11  ;;  %v1150_v12 = vpop.f32.mrf.mxu0 }
0x13fd   :  { %v1831_v13 = vpop.eup %1830 }
0x13fe   :  { %v1158_v53 = vadd.f32 1.0, %v1831_v13 }
0x1400   :  { %1832 = vrcp.f32 %v1158_v53  ;;  %v1170_v20 = vand.u32 2147483648, %v1158_v53  ;;  %v1168_v22 = vand.u32 2147483647, %v1158_v53  ;;  %vm1164_vm0 = vweird.f32 %v1158_v53 }
0x1402   :  { %v1171_v8 = vor.u32 1.1754944e-38, %v1170_v20  ;;  %vm1169_vm4 = vcmp.eq.f32.partialorder %v1168_v22, 8.507059e+37 }
0x1406   :  { %v1833_v15 = vpop.eup %1832 }
0x1407   :  { %v1160_v16 = vmul.f32 %v1833_v15, %v1158_v53  ;;  %vm1165_vm15 = vweird.f32 %v1833_v15 }
0x1408   :  { %vm1166_vm2 = vmor %vm1164_vm0, %vm1165_vm15 }
0x1409   :  { %v1161_v18 = vsub.f32 1.0, %v1160_v16 }
0x140b   :  { %v1162_v21 = vmul.f32 %v1833_v15, %v1161_v18 }
0x140d   :  { %v1163_v24 = vadd.f32 %v1833_v15, %v1162_v21 }
0x140f   :  { %v1167_v25 = vsel %vm1166_vm2, %v1833_v15, %v1163_v24 }
0x1410   :  { %v1172_v27 = vsel %vm1169_vm4, %v1171_v8, %v1167_v25 }
0x1411   :  { %v1174_v28 = vmul.f32 2.0, %v1172_v27 }
0x1413   :  { %v1708_v29 = vadd.f32 -1.0, %v1174_v28 }
0x1415   :  { %v1176_v30 = vsel %vm2155_vm3, %v1708_v29, %v1172_v27 }
0x1416   :  { %1179 = vrot.lane.b32.xlu1 %v1176_v30, %s2052_s17  ;;  %v1177_v33 = vmul.f32 %v1176_v30, %v1124_v57 }
0x1488   :  { %v1180_v31 = vpop.permute.xlu1 %1179 }
0x1489   :  { %v1182_v32 = vmul.f32 %v1180_v31, %v1176_v30 }
0x148b   :  { %1184 = vrot.lane.b32.xlu2 %v1182_v32, %s2062_s19 }
0x14e5   :  { %v1185_v34 = vpop.permute.xlu2 %1184 }
0x14e6   :  { %v1187_v35 = vadd.f32 %v1185_v34, %v1177_v33 }
0x14e8   :  { %1834 = vtanh.f32 %v1187_v35 }
0x14ee   :  { %v1835_v36 = vpop.eup %1834 }
0x14ef   :  { %1190 = vrot.lane.b32.xlu0 %v1835_v36, %s2052_s17 }
0x1561   :  { %v1191_v37 = vpop.permute.xlu0 %1190 }
0x1562   :  { %v1193_v5 = vmul.f32 %v1191_v37, %v1176_v30 }
0x1564   :  { %v1194_v7 = vpack.c.bf16 %v1193_v5, %v1193_v5 }
0x1566   :  { %1197 = vrot.lane.b32.xlu1 %v1194_v7, %s2062_s19 }
0x15d8   :  { %v1198_v38 = vpop.permute.xlu1 %1197 }
0x15d9   :  { %1709 = vmatmul.msk.bf16.vlgmr.msra.gmra.mxu1 %vm224_vm8, %v1198_v38 }
0x1656   :  { %v1211_v42 = vpop.f32.mrf.mxu1 }
0x1657   :  { %v1215_v43 = vadd.f32 %v1211_v42, %v976_v40  ;;  %v1872_v40 = vld [vmem:[%s2426_s3] ss:$0 sm:$0xff] }
0x1658   :  { %v197_v42 = vadd.f32 %v1872_v40, %v2325_v63 }
0x1659   :  { %v1216_v45 = vmul.f32 2.0, %v1215_v43 }
0x165b   :  { %v1217_v46 = vsel %vm2155_vm3, %v1216_v45, %v1215_v43  ;;  %v850_v43 = vadd.f32 %v2305_v26, %v197_v42 }
0x165c   :  { %v1710_v47 = vmul.f32 -1.442695, %v1217_v46 }
0x165d   :  { %v851_v45 = vmul.f32 2.0, %v850_v43 }
0x165e   :  { %1836 = vpow2.f32 %v1710_v47  ;;  %v1213_v48 = vpop.f32.mrf.mxu1 }
0x165f   :  { %v852_v46 = vsel %vm2155_vm3, %v851_v45, %v850_v43 }
0x1660   :  { %v1663_v47 = vmul.f32 -1.442695, %v852_v46 }
0x1664   :  { %v1837_v49 = vpop.eup %1836 }
0x1665   :  { %v1221_v50 = vadd.f32 1.0, %v1837_v49 }
0x1667   :  { %1838 = vrcp.f32 %v1221_v50  ;;  %v1233_v55 = vand.u32 2147483648, %v1221_v50  ;;  %v1231_v57 = vand.u32 2147483647, %v1221_v50  ;;  %vm1227_vm6 = vweird.f32 %v1221_v50 }
0x1669   :  { %v1234_v58 = vor.u32 1.1754944e-38, %v1233_v55  ;;  %vm1232_vm9 = vcmp.eq.f32.partialorder %v1231_v57, 8.507059e+37 }
0x166d   :  { %v1839_v51 = vpop.eup %1838 }
0x166e   :  { %v1223_v52 = vmul.f32 %v1839_v51, %v1221_v50  ;;  %vm1228_vm5 = vweird.f32 %v1839_v51 }
0x166f   :  { %vm1229_vm7 = vmor %vm1227_vm6, %vm1228_vm5 }
0x1670   :  { %v1224_v54 = vsub.f32 1.0, %v1223_v52 }
0x1672   :  { %v1225_v56 = vmul.f32 %v1839_v51, %v1224_v54 }
0x1674   :  { %v1226_v44 = vadd.f32 %v1839_v51, %v1225_v56 }
0x1676   :  { %v1230_v61 = vsel %vm1229_vm7, %v1839_v51, %v1226_v44 }
0x1677   :  { %v1235_v59 = vsel %vm1232_vm9, %v1234_v58, %v1230_v61 }
0x1678   :  { %v1237_v60 = vmul.f32 2.0, %v1235_v59 }
0x167a   :  { %v1711_v62 = vadd.f32 -1.0, %v1237_v60 }
0x167c   :  { %v1239_v41 = vsel %vm2155_vm3, %v1711_v62, %v1235_v59 }
0x167d   :  { %1242 = vrot.lane.b32.xlu2 %v1239_v41, %s2052_s17  ;;  %v1240_v4 = vmul.f32 %v1239_v41, %v1187_v35 }
0x1685   :  { %633 = vrot.lane.b32.xlu2 %v2220_v19, %s2062_s19 }
0x16d7   :  { %v1243_v0 = vpop.permute.xlu2 %1242 }
0x16d8   :  { %v1245_v2 = vmul.f32 %v1243_v0, %v1239_v41 }
0x16da   :  { %1247 = vrot.lane.b32.xlu0 %v1245_v2, %s2062_s19 }
0x16df   :  { %v634_v23 = vpop.permute.xlu2 %633 }
0x16e0   :  { %637 = vst.msk [vmem:[#allocation3 + $0x10] sm:$0xf] %vm288_vm1, %v634_v23 }
0x16e2   :  { %720 = vrot.lane.b32.xlu0 %v2242_v1, %s2062_s19 }
0x174c   :  { %v1248_v9 = vpop.permute.xlu0 %1247 }
0x174d   :  { %v2349_v10 = vadd.f32 %v1248_v9, %v1240_v4 }
0x174f   :  { %1840 = vtanh.f32 %v2349_v10 }
0x1754   :  { %v721_v11 = vpop.permute.xlu0 %720 }
0x1755   :  { %v1841_v12 = vpop.eup %1840  ;;  %724 = vst.msk [vmem:[#allocation3 + $0x14] sm:$0xf] %vm288_vm1, %v721_v11 }
0x1756   :  { %1253 = vrot.lane.b32.xlu1 %v1841_v12, %s2052_s17 }
0x175c   :  { %v1752_v19 = vld [vmem:[#allocation3 + $0x10] sm:$0xff] }
0x175d   :  { %1691 = vmatmul.msk.bf16.gmra.mxu3 %vm224_vm8, %v1752_v19 }
0x17c8   :  { %v1254_v13 = vpop.permute.xlu1 %1253 }
0x17c9   :  { %v1256_v53 = vmul.f32 %v1254_v13, %v1239_v41 }
0x17cb   :  { %v1257_v15 = vpack.c.bf16 %v1256_v53, %v1256_v53 }
0x17cd   :  { %1260 = vrot.lane.b32.xlu1 %v1257_v15, %s2062_s19 }
0x17e0   :  { %v978_v16 = vpop.f32.mrf.mxu3 }
0x17e1   :  { %v979_v18 = vadd.f32 %v2270_v6, %v978_v16 }
0x17e8   :  { %v980_v53 = vpop.f32.mrf.mxu3 }
0x183f   :  { %v1261_v1 = vpop.permute.xlu1 %1260 }
0x1840   :  { %1712 = vmatmul.msk.bf16.vlgmr.msra.gmra.mxu2 %vm224_vm8, %v1261_v1 }
0x18c3   :  { %v1274_v20 = vpop.f32.mrf.mxu2 }
0x18c4   :  { %v1278_v21 = vadd.f32 %v1274_v20, %v979_v18 }
0x18c6   :  { %v1279_v22 = vmul.f32 2.0, %v1278_v21 }
0x18c8   :  { %v1280_v24 = vsel %vm2155_vm3, %v1279_v22, %v1278_v21 }
0x18c9   :  { %v1713_v8 = vmul.f32 -1.442695, %v1280_v24 }
0x18cb   :  { %1842 = vpow2.f32 %v1713_v8  ;;  %v1276_v25 = vpop.f32.mrf.mxu2 }
0x18d1   :  { %v1843_v27 = vpop.eup %1842 }
0x18d2   :  { %v1284_v28 = vadd.f32 1.0, %v1843_v27 }
0x18d4   :  { %1844 = vrcp.f32 %v1284_v28  ;;  %v1296_v32 = vand.u32 2147483648, %v1284_v28  ;;  %v1294_v34 = vand.u32 2147483647, %v1284_v28  ;;  %vm1290_vm11 = vweird.f32 %v1284_v28 }
0x18d5   :  { %1846 = vpow2.f32 %v1663_v47 }
0x18d6   :  { %v1297_v36 = vor.u32 1.1754944e-38, %v1296_v32  ;;  %vm1295_vm13 = vcmp.eq.f32.partialorder %v1294_v34, 8.507059e+37 }
0x18da   :  { %v1845_v29 = vpop.eup %1844 }
0x18db   :  { %v1286_v30 = vmul.f32 %v1845_v29, %v1284_v28  ;;  %vm1291_vm10 = vweird.f32 %v1845_v29  ;;  %v1847_v48 = vpop.eup %1846 }
0x18dc   :  { %vm1292_vm12 = vmor %vm1290_vm11, %vm1291_vm10  ;;  %v856_v49 = vadd.f32 1.0, %v1847_v48 }
0x18dd   :  { %v1287_v31 = vsub.f32 1.0, %v1286_v30 }
0x18de   :  { %1848 = vrcp.f32 %v856_v49  ;;  %v868_v56 = vand.u32 2147483648, %v856_v49  ;;  %vm862_vm15 = vweird.f32 %v856_v49  ;;  %v866_v63 = vand.u32 2147483647, %v856_v49 }
0x18df   :  { %v1288_v33 = vmul.f32 %v1845_v29, %v1287_v31 }
0x18e0   :  { %v869_v57 = vor.u32 1.1754944e-38, %v868_v56  ;;  %vm867_vm2 = vcmp.eq.f32.partialorder %v866_v63, 8.507059e+37 }
0x18e1   :  { %v1289_v35 = vadd.f32 %v1845_v29, %v1288_v33 }
0x18e3   :  { %v1293_v37 = vsel %vm1292_vm12, %v1845_v29, %v1289_v35 }
0x18e4   :  { %v1298_v5 = vsel %vm1295_vm13, %v1297_v36, %v1293_v37  ;;  %v1849_v50 = vpop.eup %1848 }
0x18e5   :  { %v1300_v7 = vmul.f32 2.0, %v1298_v5  ;;  %v858_v51 = vmul.f32 %v1849_v50, %v856_v49  ;;  %vm863_vm14 = vweird.f32 %v1849_v50 }
0x18e6   :  { %vm864_vm0 = vmor %vm862_vm15, %vm863_vm14 }
0x18e7   :  { %v1714_v38 = vadd.f32 -1.0, %v1300_v7  ;;  %v859_v52 = vsub.f32 1.0, %v858_v51 }
0x18e9   :  { %v1302_v39 = vsel %vm2155_vm3, %v1714_v38, %v1298_v5  ;;  %v860_v54 = vmul.f32 %v1849_v50, %v859_v52 }
0x18ea   :  { %1305 = vrot.lane.b32.xlu2 %v1302_v39, %s2052_s17  ;;  %v1303_v41 = vmul.f32 %v1302_v39, %v2349_v10  ;;  %v981_v10 = vadd.f32 %v2270_v6, %v980_v53 }
0x18eb   :  { %v861_v55 = vadd.f32 %v1849_v50, %v860_v54 }
0x18ed   :  { %v865_v26 = vsel %vm864_vm0, %v1849_v50, %v861_v55 }
0x18ee   :  { %v870_v44 = vsel %vm867_vm2, %v869_v57, %v865_v26 }
0x18ef   :  { %v872_v59 = vmul.f32 2.0, %v870_v44 }
0x18f1   :  { %v1664_v60 = vadd.f32 -1.0, %v872_v59 }
0x18f3   :  { %v874_v62 = vsel %vm2155_vm3, %v1664_v60, %v870_v44 }
0x18f4   :  { %v875_v36 = vmul.f32 %v874_v62, %v2284_v3 }
0x1944   :  { %v1306_v58 = vpop.permute.xlu2 %1305 }
0x1945   :  { %v1308_v61 = vmul.f32 %v1306_v58, %v1302_v39 }
0x1947   :  { %1310 = vrot.lane.b32.xlu0 %v1308_v61, %s2062_s19 }
0x194f   :  { %877 = vrot.lane.b32.xlu0 %v874_v62, %s2052_s17 }
0x19b9   :  { %v1311_v0 = vpop.permute.xlu0 %1310 }
0x19ba   :  { %v1313_v2 = vadd.f32 %v1311_v0, %v1303_v41 }
0x19bc   :  { %1850 = vtanh.f32 %v1313_v2 }
0x19c1   :  { %v878_v12 = vpop.permute.xlu0 %877 }
0x19c2   :  { %v1851_v23 = vpop.eup %1850  ;;  %v880_v19 = vmul.f32 %v878_v12, %v874_v62 }
0x19c3   :  { %1316 = vrot.lane.b32.xlu1 %v1851_v23, %s2052_s17 }
0x1a35   :  { %v1317_v4 = vpop.permute.xlu1 %1316 }
0x1a36   :  { %v1319_v9 = vmul.f32 %v1317_v4, %v1302_v39 }
0x1a38   :  { %v1320_v11 = vpack.c.bf16 %v1319_v9, %v1319_v9 }
0x1a3a   :  { %1323 = vrot.lane.b32.xlu2 %v1320_v11, %s2062_s19 }
0x1a42   :  { %882 = vrot.lane.b32.xlu2 %v880_v19, %s2062_s19 }
0x1a94   :  { %v1324_v13 = vpop.permute.xlu2 %1323 }
0x1a95   :  { %1715 = vmatmul.msk.bf16.vlgmr.msra.gmra.mxu0 %vm224_vm8, %v1324_v13 }
0x1a9c   :  { %v883_v34 = vpop.permute.xlu2 %882 }
0x1a9d   :  { %v885_v5 = vadd.f32 %v883_v34, %v875_v36 }
0x1b12   :  { %v1337_v15 = vpop.f32.mrf.mxu0 }
0x1b13   :  { %v1341_v1 = vadd.f32 %v1337_v15, %v981_v10 }
0x1b15   :  { %v1342_v16 = vmul.f32 2.0, %v1341_v1 }
0x1b17   :  { %v1343_v18 = vsel %vm2155_vm3, %v1342_v16, %v1341_v1 }
0x1b18   :  { %v1716_v20 = vmul.f32 -1.442695, %v1343_v18 }
0x1b1a   :  { %1852 = vpow2.f32 %v1716_v20  ;;  %v1339_v21 = vpop.f32.mrf.mxu0 }
0x1b20   :  { %v1853_v22 = vpop.eup %1852 }
0x1b21   :  { %v1347_v24 = vadd.f32 1.0, %v1853_v22 }
0x1b23   :  { %1854 = vrcp.f32 %v1347_v24  ;;  %v1359_v28 = vand.u32 2147483648, %v1347_v24  ;;  %v1357_v30 = vand.u32 2147483647, %v1347_v24  ;;  %vm1353_vm5 = vweird.f32 %v1347_v24 }
0x1b24   :  { %1856 = vtanh.f32 %v885_v5 }
0x1b25   :  { %v1360_v32 = vor.u32 1.1754944e-38, %v1359_v28  ;;  %vm1358_vm7 = vcmp.eq.f32.partialorder %v1357_v30, 8.507059e+37 }
0x1b29   :  { %v1855_v8 = vpop.eup %1854 }
0x1b2a   :  { %v1349_v25 = vmul.f32 %v1855_v8, %v1347_v24  ;;  %vm1354_vm4 = vweird.f32 %v1855_v8  ;;  %v1857_v39 = vpop.eup %1856 }
0x1b2b   :  { %vm1355_vm6 = vmor %vm1353_vm5, %vm1354_vm4 }
0x1b2c   :  { %v1350_v27 = vsub.f32 1.0, %v1349_v25 }
0x1b2e   :  { %v1351_v29 = vmul.f32 %v1855_v8, %v1350_v27 }
0x1b30   :  { %v1352_v31 = vadd.f32 %v1855_v8, %v1351_v29 }
0x1b32   :  { %v1356_v33 = vsel %vm1355_vm6, %v1855_v8, %v1352_v31 }
0x1b33   :  { %v1361_v35 = vsel %vm1358_vm7, %v1360_v32, %v1356_v33 }
0x1b34   :  { %v1363_v37 = vmul.f32 2.0, %v1361_v35 }
0x1b36   :  { %v1717_v7 = vadd.f32 -1.0, %v1363_v37 }
0x1b38   :  { %v1365_v38 = vsel %vm2155_vm3, %v1717_v7, %v1361_v35 }
0x1b39   :  { %1368 = vrot.lane.b32.xlu1 %v1365_v38, %s2052_s17  ;;  %v1366_v3 = vmul.f32 %v1365_v38, %v1313_v2 }
0x1b41   :  { %888 = vrot.lane.b32.xlu1 %v1857_v39, %s2052_s17 }
0x1bab   :  { %v1369_v40 = vpop.permute.xlu1 %1368 }
0x1bac   :  { %v1371_v42 = vmul.f32 %v1369_v40, %v1365_v38 }
0x1bae   :  { %1373 = vrot.lane.b32.xlu0 %v1371_v42, %s2062_s19 }
0x1bb3   :  { %v889_v43 = vpop.permute.xlu1 %888 }
0x1bb4   :  { %v891_v45 = vmul.f32 %v889_v43, %v874_v62 }
0x1bb6   :  { %v892_v46 = vpack.c.bf16 %v891_v45, %v891_v45  ;;  %807 = vrot.lane.b32.xlu0 %v2294_v17, %s2062_s19 }
0x1bb8   :  { %894 = vrot.lane.b32.xlu1 %v892_v46, %s2062_s19 }
0x1c20   :  { %v1374_v47 = vpop.permute.xlu0 %1373 }
0x1c21   :  { %v1376_v48 = vadd.f32 %v1374_v47, %v1366_v3 }
0x1c23   :  { %1858 = vtanh.f32 %v1376_v48 }
0x1c28   :  { %v808_v49 = vpop.permute.xlu0 %807 }
0x1c29   :  { %v1859_v50 = vpop.eup %1858  ;;  %811 = vst.msk [vmem:[#allocation3 + $0x18] sm:$0xf] %vm288_vm1, %v808_v49 }
0x1c2a   :  { %1379 = vrot.lane.b32.xlu2 %v1859_v50, %s2052_s17  ;;  %v895_v51 = vpop.permute.xlu1 %894 }
0x1c2b   :  { %898 = vst.msk [vmem:[#allocation3 + $0x1c] sm:$0xf] %vm288_vm1, %v895_v51 }
0x1c32   :  { %v1753_v52 = vld [vmem:[#allocation3 + $0x18] sm:$0xff] }
0x1c33   :  { %1692 = vmatmul.msk.bf16.gmra.mxu3 %vm224_vm8, %v1753_v52 }
0x1c84   :  { %v1380_v54 = vpop.permute.xlu2 %1379 }
0x1c85   :  { %v1382_v17 = vmul.f32 %v1380_v54, %v1365_v38 }
0x1c87   :  { %v1383_v55 = vpack.c.bf16 %v1382_v17, %v1382_v17 }
0x1c89   :  { %1386 = vrot.lane.b32.xlu2 %v1383_v55, %s2062_s19 }
0x1cb6   :  { %v983_v63 = vpop.f32.mrf.mxu3 }
0x1cb7   :  { %v984_v26 = vadd.f32 %v2270_v6, %v983_v63  ;;  %v1758_v63 = vld [vmem:[#allocation13] sm:$0xff] }
0x1cbe   :  { %v985_v29 = vpop.f32.mrf.mxu3 }
0x1cbf   :  { %v986_v30 = vadd.f32 %v2270_v6, %v985_v29 }
0x1ce3   :  { %v1387_v56 = vpop.permute.xlu2 %1386 }
0x1ce4   :  { %1718 = vmatmul.msk.bf16.vlgmr.msrb.gmra.mxu1 %vm224_vm8, %v1387_v56  ;;  %v1759_v56 = vld [vmem:[#allocation13 + $0x8] sm:$0xff] }
0x1ce5   :  { %1542 = vmatpush.bf16.msrb.mxu0 %v1759_v56 }
0x1ce9   :  { %1543 = vmatpush.bf16.msrb.mxu0 %v1758_v63 }
0x1d61   :  { %v1400_v57 = vpop.f32.mrf.mxu1 }
0x1d62   :  { %v1404_v44 = vadd.f32 %v1400_v57, %v984_v26 }
0x1d64   :  { %v1405_v58 = vmul.f32 2.0, %v1404_v44 }
0x1d66   :  { %v1406_v61 = vsel %vm2155_vm3, %v1405_v58, %v1404_v44  ;;  %v1775_v58 = vld [vmem:[%s2431_s8] ss:$0 sm:$0xff] }
0x1d67   :  { %v1719_v59 = vmul.f32 -1.442695, %v1406_v61 }
0x1d69   :  { %1860 = vpow2.f32 %v1719_v59  ;;  %v1402_v60 = vpop.f32.mrf.mxu1 }
0x1d6f   :  { %v1861_v62 = vpop.eup %1860 }
0x1d70   :  { %v1410_v41 = vadd.f32 1.0, %v1861_v62 }
0x1d72   :  { %1862 = vrcp.f32 %v1410_v41  ;;  %v1422_v4 = vand.u32 2147483648, %v1410_v41  ;;  %v1420_v11 = vand.u32 2147483647, %v1410_v41  ;;  %vm1416_vm9 = vweird.f32 %v1410_v41 }
0x1d74   :  { %v1423_v19 = vor.u32 1.1754944e-38, %v1422_v4  ;;  %vm1421_vm11 = vcmp.eq.f32.partialorder %v1420_v11, 8.507059e+37 }
0x1d78   :  { %v1863_v0 = vpop.eup %1862 }
0x1d79   :  { %v1412_v2 = vmul.f32 %v1863_v0, %v1410_v41  ;;  %vm1417_vm1 = vweird.f32 %v1863_v0 }
0x1d7a   :  { %vm1418_vm10 = vmor %vm1416_vm9, %vm1417_vm1 }
0x1d7b   :  { %v1413_v23 = vsub.f32 1.0, %v1412_v2 }
0x1d7d   :  { %v1414_v9 = vmul.f32 %v1863_v0, %v1413_v23 }
0x1d7f   :  { %v1415_v12 = vadd.f32 %v1863_v0, %v1414_v9 }
0x1d81   :  { %v1419_v13 = vsel %vm1418_vm10, %v1863_v0, %v1415_v12 }
0x1d82   :  { %v1424_v53 = vsel %vm1421_vm11, %v1423_v19, %v1419_v13 }
0x1d83   :  { %v1426_v10 = vmul.f32 2.0, %v1424_v53 }
0x1d85   :  { %v1720_v15 = vadd.f32 -1.0, %v1426_v10 }
0x1d87   :  { %v1428_v1 = vsel %vm2155_vm3, %v1720_v15, %v1424_v53 }
0x1d88   :  { %1431 = vrot.lane.b32.xlu0 %v1428_v1, %s2052_s17  ;;  %v1429_v20 = vmul.f32 %v1428_v1, %v1376_v48 }
0x1dfa   :  { %v1432_v16 = vpop.permute.xlu0 %1431 }
0x1dfb   :  { %v1434_v18 = vmul.f32 %v1432_v16, %v1428_v1 }
0x1dfd   :  { %1436 = vrot.lane.b32.xlu1 %v1434_v18, %s2062_s19 }
0x1e6f   :  { %v1437_v21 = vpop.permute.xlu1 %1436 }
0x1e70   :  { %v1439_v22 = vadd.f32 %v1437_v21, %v1429_v20 }
0x1e72   :  { %1864 = vtanh.f32 %v1439_v22 }
0x1e78   :  { %v1865_v24 = vpop.eup %1864 }
0x1e79   :  { %1442 = vrot.lane.b32.xlu2 %v1865_v24, %s2052_s17 }
0x1ed3   :  { %v1443_v8 = vpop.permute.xlu2 %1442 }
0x1ed4   :  { %v1445_v25 = vmul.f32 %v1443_v8, %v1428_v1 }
0x1ed6   :  { %v1446_v27 = vpack.c.bf16 %v1445_v25, %v1445_v25 }
0x1ed8   :  { %1449 = vrot.lane.b32.xlu0 %v1446_v27, %s2062_s19 }
0x1f4a   :  { %v1450_v28 = vpop.permute.xlu0 %1449 }
0x1f4b   :  { %1721 = vmatmul.msk.bf16.vlgmr.msrb.gmra.mxu2 %vm224_vm8, %v1450_v28 }
0x1fce   :  { %v1463_v31 = vpop.f32.mrf.mxu2 }
0x1fcf   :  { %v1467_v32 = vadd.f32 %v1463_v31, %v986_v30 }
0x1fd1   :  { %v1468_v33 = vmul.f32 2.0, %v1467_v32 }
0x1fd3   :  { %v1469_v34 = vsel %vm2155_vm3, %v1468_v33, %v1467_v32 }
0x1fd4   :  { %v1722_v35 = vmul.f32 -1.442695, %v1469_v34 }
0x1fd6   :  { %1866 = vpow2.f32 %v1722_v35  ;;  %v1465_v36 = vpop.f32.mrf.mxu2 }
0x1fdc   :  { %v1867_v37 = vpop.eup %1866 }
0x1fdd   :  { %v1473_v5 = vadd.f32 1.0, %v1867_v37 }
0x1fdf   :  { %1868 = vrcp.f32 %v1473_v5  ;;  %v1485_v40 = vand.u32 2147483648, %v1473_v5  ;;  %v1483_v43 = vand.u32 2147483647, %v1473_v5  ;;  %vm1479_vm13 = vweird.f32 %v1473_v5 }
0x1fe1   :  { %v1486_v45 = vor.u32 1.1754944e-38, %v1485_v40  ;;  %vm1484_vm15 = vcmp.eq.f32.partialorder %v1483_v43, 8.507059e+37 }
0x1fe5   :  { %v1869_v7 = vpop.eup %1868 }
0x1fe6   :  { %v1475_v38 = vmul.f32 %v1869_v7, %v1473_v5  ;;  %vm1480_vm12 = vweird.f32 %v1869_v7 }
0x1fe7   :  { %vm1481_vm14 = vmor %vm1479_vm13, %vm1480_vm12 }
0x1fe8   :  { %v1476_v39 = vsub.f32 1.0, %v1475_v38 }
0x1fea   :  { %v1477_v42 = vmul.f32 %v1869_v7, %v1476_v39 }
0x1fec   :  { %v1478_v6 = vadd.f32 %v1869_v7, %v1477_v42 }
0x1fee   :  { %v1482_v46 = vsel %vm1481_vm14, %v1869_v7, %v1478_v6 }
0x1fef   :  { %v1487_v3 = vsel %vm1484_vm15, %v1486_v45, %v1482_v46 }
0x1ff0   :  { %v1489_v47 = vmul.f32 2.0, %v1487_v3 }
0x1ff2   :  { %v1723_v48 = vadd.f32 -1.0, %v1489_v47 }
0x1ff4   :  { %v1491_v49 = vsel %vm2155_vm3, %v1723_v48, %v1487_v3 }
0x1ff5   :  { %1494 = vrot.lane.b32.xlu1 %v1491_v49, %s2052_s17  ;;  %v1492_v52 = vmul.f32 %v1491_v49, %v1439_v22 }
0x2067   :  { %v1495_v50 = vpop.permute.xlu1 %1494 }
0x2068   :  { %v1497_v51 = vmul.f32 %v1495_v50, %v1491_v49 }
0x206a   :  { %1499 = vrot.lane.b32.xlu2 %v1497_v51, %s2062_s19 }
0x20c4   :  { %v1500_v54 = vpop.permute.xlu2 %1499 }
0x20c5   :  { %v1502_v17 = vadd.f32 %v1500_v54, %v1492_v52 }
0x20c7   :  { %1870 = vtanh.f32 %v1502_v17 }
0x20cd   :  { %v1871_v55 = vpop.eup %1870 }
0x20ce   :  { %1505 = vrot.lane.b32.xlu0 %v1871_v55, %s2052_s17 }
0x2140   :  { %v1506_v26 = vpop.permute.xlu0 %1505 }
0x2141   :  { %v1508_v14 = vmul.f32 %v1506_v26, %v1491_v49 }
0x2143   :  { %v1509_v57 = vpack.c.bf16 %v1508_v14, %v1508_v14 }
0x2145   :  { %1519 = vrot.lane.b32.xlu1 %v1509_v57, %s2062_s19 }
0x21b7   :  { %v1520_v44 = vpop.permute.xlu1 %1519 }
0x21b8   :  { %1732 = vmatmul.msk.bf16.vlgmr.msrb.gmra.mxu0 %vm224_vm8, %v1520_v44 }
0x2235   :  { %v1545_v61 = vpop.f32.mrf.mxu0 }
0x2236   :  { %v1546_v59 = vadd.f32 %v1775_v58, %v1545_v61 }
0x2238   :  { %1549 = vst [vmem:[#allocation15] sm:$0xff] %v1546_v59 }
0x2239   :  { %1560 = dma.vmem_to_hbm [thread:$0]  %s1556_s23, 128, %s1558_s25, [#allocation6]  }
0x223d   :  { %v1547_v60 = vpop.f32.mrf.mxu0 }
0x223e   :  { %2049 = dma.done.wait [#allocation6], 128  }
0x223f   :  { %2050 = vsyncadd [#allocation6], 4294967168 }
0x2240   :  { %1565 = vsyncpa [#allocation5], 1 }
0x2241   :  { %1566 = vsyncpa [#allocation8], 1 }
0x2242   :  { %1567 = vsyncpa [#allocation11], 1 }
0x2243   :  { %1568 = vsyncpa [#allocation14], 1 }
0x2244   :  { %1569 = vsyncpa [#allocation6], 1 }

</bundles_post_ra>
